<compile_context>
chip_gen: v6e
topology: v6e:2x2x1
jax: 0.10.0
libtpu: 0.0.40
codegen_flags: <defaults>
</compile_context>

<pallas_src>
import jax
import jax.numpy as jnp
import numpy as np
from jax.experimental import pallas as pl
from jax.experimental.pallas import tpu as pltpu


def _round_up(x, m):
    return (x + m - 1) // m * m


@jax.jit
def conv_block_forward(x_nchw, w_hwio, bias, gamma, beta):
    """x_nchw: (N, Cin, H, W) -> (N, Cout, H//2, W//2), matching PyTorch."""
    del bias  # cancels exactly under batch-statistics BatchNorm (see header)
    N, Cin, H, W = x_nchw.shape
    Cout = w_hwio.shape[-1]
    if H % 2 or W % 2:
        raise NotImplementedError(
            "conv_block kernel assumes even H and W (BN statistics + "
            "MaxPool2d(2) with no remainder).")
    Ho, Wo = H // 2, W // 2
    Hp, Wp = Ho + 1, Wo + 1        # phase-grid dims of the padded input
    L = Ho * Wp                    # conv-output columns per phase per image
    PP = Hp * Wp + 1               # flat phase-grid length (+1 slack for the
                                   # (dh, dw) = (1, 1) shifted slice)
    CinP = _round_up(Cin, 8)       # sublane-aligned per-phase channel slices

    # ---- wrapper glue (1x input size): pad, phase-split, cast to bf16 ------
    xp = jnp.pad(x_nchw.astype(jnp.float32),
                 ((0, 0), (0, CinP - Cin), (1, 1), (1, 1)))   # (N,CinP,H+2,W+2)
    xp = xp.reshape(N, CinP, Hp, 2, Wp, 2)
    xp = jnp.transpose(xp, (0, 3, 5, 1, 2, 4))                # n,a,b,c,i,j
    xp = xp.reshape(N, 4 * CinP, Hp * Wp)
    xp = jnp.pad(xp, ((0, 0), (0, 0), (0, PP - Hp * Wp))).astype(jnp.bfloat16)

    wt = jnp.pad(w_hwio.astype(jnp.float32),
                 ((0, 0), (0, 0), (0, CinP - Cin), (0, 0)))   # (3,3,CinP,Cout)
    wt = jnp.transpose(wt, (0, 1, 3, 2)).reshape(9, Cout, CinP)
    wt = wt.astype(jnp.bfloat16)

    # valid-column mask: column l of a phase slab is (ho, wo) = (l//Wp, l%Wp);
    # wo == Wo is the garbage column introduced by the shifted-slice trick.
    col_mask = ((jnp.arange(L) % Wp) < Wo).astype(jnp.float32).reshape(1, L)

    # ---- pass 1: conv (in-kernel shifted-slice im2col) + BN partial stats ---
    def conv_stats_kernel(x_ref, w_ref, m_ref, z_ref, st_ref):
        xt = x_ref[0]                                   # (4*CinP, PP) bf16
        w_all = w_ref[...]                              # (9, Cout, CinP) bf16
        msk = m_ref[...]                                # (1, L) f32

        # 16 distinct shifted views reused by the 36 (pool-phase, tap) pairs.
        view = {}
        for ph in range(4):
            for dh in range(2):
                for dw in range(2):
                    off = dh * Wp + dw
                    view[(ph, dh, dw)] = xt[ph * CinP:(ph + 1) * CinP,
                                            off:off + L]

        s = jnp.zeros((Cout, 1), jnp.float32)
        ss = jnp.zeros((Cout, 1), jnp.float32)
        for ph_h in range(2):                           # output pooling phase
            for ph_w in range(2):
                q = 2 * ph_h + ph_w
                acc = jnp.zeros((Cout, L), jnp.float32)
                for kh in range(3):                     # 3x3 taps
                    for kw in range(3):
                        u, v = ph_h + kh, ph_w + kw
                        a, dh = u % 2, u // 2           # input phase / shift
                        b, dw = v % 2, v // 2
                        acc = acc + jnp.dot(
                            w_all[kh * 3 + kw],
                            view[(2 * a + b, dh, dw)],
                            preferred_element_type=jnp.float32)
                z_ref[0, q * Cout:(q + 1) * Cout, :] = acc
                am = acc * msk                          # drop garbage columns
                s = s + jnp.sum(am, axis=1, keepdims=True)
                ss = ss + jnp.sum(am * acc, axis=1, keepdims=True)
        st_ref[0] = jnp.concatenate([s, ss], axis=1)    # (Cout, 2)

    z_all, stats = pl.pallas_call(
        conv_stats_kernel,
        out_shape=[jax.ShapeDtypeStruct((N, 4 * Cout, L), jnp.float32),
                   jax.ShapeDtypeStruct((N, Cout, 2), jnp.float32)],
        grid=(N,),
        in_specs=[pl.BlockSpec((1, 4 * CinP, PP), lambda n: (n, 0, 0)),
                  pl.BlockSpec((9, Cout, CinP), lambda n: (0, 0, 0)),
                  pl.BlockSpec((1, L), lambda n: (0, 0))],
        out_specs=[pl.BlockSpec((1, 4 * Cout, L), lambda n: (n, 0, 0)),
                   pl.BlockSpec((1, Cout, 2), lambda n: (n, 0, 0))],
        compiler_params=pltpu.CompilerParams(
            dimension_semantics=("parallel",)),
    )(xp, wt, col_mask)

    # ---- fold BN (batch stats, biased var) into per-channel scale/shift ----
    tot = jnp.sum(stats, axis=0)                        # (Cout, 2) f32
    cnt = jnp.float32(N * H * W)
    mean = tot[:, 0] / cnt
    var = tot[:, 1] / cnt - mean * mean
    scale = gamma.astype(jnp.float32) * jax.lax.rsqrt(var + 1e-5)
    shift = beta.astype(jnp.float32) - mean * scale
    scale = scale.reshape(Cout, 1)
    shift = shift.reshape(Cout, 1)

    # ---- pass 2: relu(z*scale + shift), max over the 4 pooling phases ------
    def bn_relu_pool_kernel(z_ref, sc_ref, sh_ref, o_ref):
        zt = z_ref[0]                                   # (4*Cout, L) f32
        sc, sh = sc_ref[...], sh_ref[...]               # (Cout, 1) each
        y = zt[0:Cout, :] * sc + sh
        for q in range(1, 4):
            y = jnp.maximum(y, zt[q * Cout:(q + 1) * Cout, :] * sc + sh)
        o_ref[0] = jnp.maximum(y, 0.0)                  # ReLU + 2x2 max pool

    pooled = pl.pallas_call(
        bn_relu_pool_kernel,
        out_shape=jax.ShapeDtypeStruct((N, Cout, L), jnp.float32),
        grid=(N,),
        in_specs=[pl.BlockSpec((1, 4 * Cout, L), lambda n: (n, 0, 0)),
                  pl.BlockSpec((Cout, 1), lambda n: (0, 0)),
                  pl.BlockSpec((Cout, 1), lambda n: (0, 0))],
        out_specs=pl.BlockSpec((1, Cout, L), lambda n: (n, 0, 0)),
        compiler_params=pltpu.CompilerParams(
            dimension_semantics=("parallel",)),
    )(z_all, scale, shift)

    # Already NCHW-ordered; only drop the garbage column (Wp = Wo + 1).
    return pooled.reshape(N, Cout, Ho, Wp)[:, :, :, :Wo]


def reference_forward(x_nchw, w_hwio, bias, gamma, beta):
    """Pure-JAX reference with the PyTorch module's semantics."""
    x_nhwc = jnp.transpose(x_nchw, (0, 2, 3, 1)).astype(jnp.float32)
    z = jax.lax.conv_general_dilated(
        x_nhwc, w_hwio.astype(jnp.float32),
        window_strides=(1, 1), padding=((1, 1), (1, 1)),
        dimension_numbers=("NHWC", "HWIO", "NHWC")) + bias
    mean = jnp.mean(z, axis=(0, 1, 2))
    var = jnp.mean((z - mean) ** 2, axis=(0, 1, 2))     # biased batch var
    y = (z - mean) * jax.lax.rsqrt(var + 1e-5) * gamma + beta
    y = jnp.maximum(y, 0.0)
    N, H, W, C = y.shape
    y = jnp.max(y.reshape(N, H // 2, 2, W // 2, 2, C), axis=(2, 4))
    return jnp.transpose(y, (0, 3, 1, 2))


if __name__ == "__main__":
    # Small shapes consistent with the module: batch=2, in_ch=4, out_ch=8, 16x16.
    N, Cin, Cout, H, W = 2, 4, 8, 16, 16

    key = jax.random.PRNGKey(0)
    kx, kw, kb, kg, kbe = jax.random.split(key, 5)

    x = jax.random.normal(kx, (N, Cin, H, W), jnp.float32)

    fan_in = Cin * 3 * 3
    bound = 1.0 / np.sqrt(fan_in)
    w_hwio = jax.random.uniform(kw, (3, 3, Cin, Cout), jnp.float32, -bound, bound)
    bias = jax.random.uniform(kb, (Cout,), jnp.float32, -bound, bound)
    gamma = jax.random.uniform(kg, (Cout,), jnp.float32, 0.5, 1.5)
    beta = 0.1 * jax.random.normal(kbe, (Cout,), jnp.float32)

    out = conv_block_forward(x, w_hwio, bias, gamma, beta)
    out = jax.block_until_ready(out)

    ref = reference_forward(x, w_hwio, bias, gamma, beta)
    np.testing.assert_allclose(np.asarray(out), np.asarray(ref),
                               rtol=1e-2, atol=1e-2)
    assert out.shape == (N, Cout, H // 2, W // 2)

    print("KERNEL_OK")
</pallas_src>

<mosaic_0001>
module attributes {stable_mosaic.version = 11 : i64} {
  func.func @bn_relu_pool_kernel(%arg0: i32, %arg1: memref<1x32x72xf32, #tpu.memory_space<vmem>>, %arg2: memref<8x1xf32, #tpu.memory_space<vmem>>, %arg3: memref<8x1xf32, #tpu.memory_space<vmem>>, %arg4: memref<1x8x72xf32, #tpu.memory_space<vmem>>) attributes {dimension_semantics = [#tpu.dimension_semantics<parallel>], iteration_bounds = array<i64: 2>, scalar_prefetch = 0 : i64, scratch_operands = 0 : i64, tpu.core_type = #tpu.core_type<tc>, window_params = [{transform_indices = @transform_0, window_bounds = array<i64: 1, 32, 72>}, {pipeline_mode = #tpu.pipeline_mode<synchronous>, transform_indices = @transform_1, window_bounds = array<i64: 8, 1>}, {pipeline_mode = #tpu.pipeline_mode<synchronous>, transform_indices = @transform_2, window_bounds = array<i64: 8, 1>}, {transform_indices = @transform_3, window_bounds = array<i64: 1, 8, 72>}]} {
    %c0 = arith.constant 0 : index
    %c0_0 = arith.constant 0 : index
    %c0_1 = arith.constant 0 : index
    %0 = vector.load %arg1[%c0, %c0_0, %c0_1] : memref<1x32x72xf32, #tpu.memory_space<vmem>>, vector<1x32x72xf32>
    %1 = vector.shape_cast %0 : vector<1x32x72xf32> to vector<32x72xf32>
    %c0_2 = arith.constant 0 : index
    %c0_3 = arith.constant 0 : index
    %2 = vector.load %arg2[%c0_2, %c0_3] : memref<8x1xf32, #tpu.memory_space<vmem>>, vector<8x1xf32>
    %c0_4 = arith.constant 0 : index
    %c0_5 = arith.constant 0 : index
    %3 = vector.load %arg3[%c0_4, %c0_5] : memref<8x1xf32, #tpu.memory_space<vmem>>, vector<8x1xf32>
    %4 = vector.extract_strided_slice %1 {offsets = [0, 0], sizes = [8, 72], strides = [1, 1]} : vector<32x72xf32> to vector<8x72xf32>
    %5 = vector.broadcast %2 : vector<8x1xf32> to vector<8x72xf32>
    %6 = arith.mulf %4, %5 : vector<8x72xf32>
    %7 = vector.broadcast %3 : vector<8x1xf32> to vector<8x72xf32>
    %8 = arith.addf %6, %7 : vector<8x72xf32>
    %9 = vector.extract_strided_slice %1 {offsets = [8, 0], sizes = [8, 72], strides = [1, 1]} : vector<32x72xf32> to vector<8x72xf32>
    %10 = vector.broadcast %2 : vector<8x1xf32> to vector<8x72xf32>
    %11 = arith.mulf %9, %10 : vector<8x72xf32>
    %12 = vector.broadcast %3 : vector<8x1xf32> to vector<8x72xf32>
    %13 = arith.addf %11, %12 : vector<8x72xf32>
    %14 = arith.maximumf %8, %13 : vector<8x72xf32>
    %15 = vector.extract_strided_slice %1 {offsets = [16, 0], sizes = [8, 72], strides = [1, 1]} : vector<32x72xf32> to vector<8x72xf32>
    %16 = vector.broadcast %2 : vector<8x1xf32> to vector<8x72xf32>
    %17 = arith.mulf %15, %16 : vector<8x72xf32>
    %18 = vector.broadcast %3 : vector<8x1xf32> to vector<8x72xf32>
    %19 = arith.addf %17, %18 : vector<8x72xf32>
    %20 = arith.maximumf %14, %19 : vector<8x72xf32>
    %21 = vector.extract_strided_slice %1 {offsets = [24, 0], sizes = [8, 72], strides = [1, 1]} : vector<32x72xf32> to vector<8x72xf32>
    %22 = vector.broadcast %2 : vector<8x1xf32> to vector<8x72xf32>
    %23 = arith.mulf %21, %22 : vector<8x72xf32>
    %24 = vector.broadcast %3 : vector<8x1xf32> to vector<8x72xf32>
    %25 = arith.addf %23, %24 : vector<8x72xf32>
    %26 = arith.maximumf %20, %25 : vector<8x72xf32>
    %cst = arith.constant 0.000000e+00 : f32
    %27 = vector.broadcast %cst : f32 to vector<8x72xf32>
    %28 = arith.maximumf %26, %27 : vector<8x72xf32>
    %c0_6 = arith.constant 0 : index
    %c0_7 = arith.constant 0 : index
    %c0_8 = arith.constant 0 : index
    %29 = vector.load %arg4[%c0_6, %c0_7, %c0_8] : memref<1x8x72xf32, #tpu.memory_space<vmem>>, vector<1x8x72xf32>
    %30 = vector.shape_cast %29 : vector<1x8x72xf32> to vector<8x72xf32>
    %31 = vector.shape_cast %28 : vector<8x72xf32> to vector<1x8x72xf32>
    tpu.vector_store %arg4[%c0_6, %c0_7, %c0_8], %31 {strides = array<i32>} : memref<1x8x72xf32, #tpu.memory_space<vmem>>, vector<1x8x72xf32>,
    return
  }
  func.func @transform_0(%arg0: i32) -> (i32, i32, i32) {
    %c0_i32 = arith.constant 0 : i32
    %c0_i32_0 = arith.constant 0 : i32
    %c0_i32_1 = arith.constant 0 : i32
    return %arg0, %c0_i32, %c0_i32_0 : i32, i32, i32
  }
  func.func @transform_1(%arg0: i32) -> (i32, i32) {
    %c0_i32 = arith.constant 0 : i32
    %c0_i32_0 = arith.constant 0 : i32
    %c0_i32_1 = arith.constant 0 : i32
    return %c0_i32, %c0_i32_0 : i32, i32
  }
  func.func @transform_2(%arg0: i32) -> (i32, i32) {
    %c0_i32 = arith.constant 0 : i32
    %c0_i32_0 = arith.constant 0 : i32
    %c0_i32_1 = arith.constant 0 : i32
    return %c0_i32, %c0_i32_0 : i32, i32
  }
  func.func @transform_3(%arg0: i32) -> (i32, i32, i32) {
    %c0_i32 = arith.constant 0 : i32
    %c0_i32_0 = arith.constant 0 : i32
    %c0_i32_1 = arith.constant 0 : i32
    return %arg0, %c0_i32, %c0_i32_0 : i32, i32, i32
  }
}

module attributes {stable_mosaic.version = 11 : i64} {
  func.func @conv_stats_kernel(%arg0: i32, %arg1: memref<1x32x82xbf16, #tpu.memory_space<vmem>>, %arg2: memref<9x8x8xbf16, #tpu.memory_space<vmem>>, %arg3: memref<1x72xf32, #tpu.memory_space<vmem>>, %arg4: memref<1x32x72xf32, #tpu.memory_space<vmem>>, %arg5: memref<1x8x2xf32, #tpu.memory_space<vmem>>) attributes {dimension_semantics = [#tpu.dimension_semantics<parallel>], iteration_bounds = array<i64: 2>, scalar_prefetch = 0 : i64, scratch_operands = 0 : i64, tpu.core_type = #tpu.core_type<tc>, window_params = [{transform_indices = @transform_0, window_bounds = array<i64: 1, 32, 82>}, {pipeline_mode = #tpu.pipeline_mode<synchronous>, transform_indices = @transform_1, window_bounds = array<i64: 9, 8, 8>}, {pipeline_mode = #tpu.pipeline_mode<synchronous>, transform_indices = @transform_2, window_bounds = array<i64: 1, 72>}, {transform_indices = @transform_3, window_bounds = array<i64: 1, 32, 72>}, {transform_indices = @transform_4, window_bounds = array<i64: 1, 8, 2>}]} {
    %c0 = arith.constant 0 : index
    %c0_0 = arith.constant 0 : index
    %c0_1 = arith.constant 0 : index
    %0 = vector.load %arg1[%c0, %c0_0, %c0_1] : memref<1x32x82xbf16, #tpu.memory_space<vmem>>, vector<1x32x82xbf16>
    %1 = vector.shape_cast %0 : vector<1x32x82xbf16> to vector<32x82xbf16>
    %c0_2 = arith.constant 0 : index
    %c0_3 = arith.constant 0 : index
    %c0_4 = arith.constant 0 : index
    %2 = vector.load %arg2[%c0_2, %c0_3, %c0_4] : memref<9x8x8xbf16, #tpu.memory_space<vmem>>, vector<9x8x8xbf16>
    %c0_5 = arith.constant 0 : index
    %c0_6 = arith.constant 0 : index
    %3 = vector.load %arg3[%c0_5, %c0_6] : memref<1x72xf32, #tpu.memory_space<vmem>>, vector<1x72xf32>
    %4 = vector.extract_strided_slice %1 {offsets = [0, 0], sizes = [8, 72], strides = [1, 1]} : vector<32x82xbf16> to vector<8x72xbf16>
    %5 = vector.extract_strided_slice %1 {offsets = [0, 1], sizes = [8, 72], strides = [1, 1]} : vector<32x82xbf16> to vector<8x72xbf16>
    %6 = vector.extract_strided_slice %1 {offsets = [0, 9], sizes = [8, 72], strides = [1, 1]} : vector<32x82xbf16> to vector<8x72xbf16>
    %7 = vector.extract_strided_slice %1 {offsets = [0, 10], sizes = [8, 72], strides = [1, 1]} : vector<32x82xbf16> to vector<8x72xbf16>
    %8 = vector.extract_strided_slice %1 {offsets = [8, 0], sizes = [8, 72], strides = [1, 1]} : vector<32x82xbf16> to vector<8x72xbf16>
    %9 = vector.extract_strided_slice %1 {offsets = [8, 1], sizes = [8, 72], strides = [1, 1]} : vector<32x82xbf16> to vector<8x72xbf16>
    %10 = vector.extract_strided_slice %1 {offsets = [8, 9], sizes = [8, 72], strides = [1, 1]} : vector<32x82xbf16> to vector<8x72xbf16>
    %11 = vector.extract_strided_slice %1 {offsets = [8, 10], sizes = [8, 72], strides = [1, 1]} : vector<32x82xbf16> to vector<8x72xbf16>
    %12 = vector.extract_strided_slice %1 {offsets = [16, 0], sizes = [8, 72], strides = [1, 1]} : vector<32x82xbf16> to vector<8x72xbf16>
    %13 = vector.extract_strided_slice %1 {offsets = [16, 1], sizes = [8, 72], strides = [1, 1]} : vector<32x82xbf16> to vector<8x72xbf16>
    %14 = vector.extract_strided_slice %1 {offsets = [16, 9], sizes = [8, 72], strides = [1, 1]} : vector<32x82xbf16> to vector<8x72xbf16>
    %15 = vector.extract_strided_slice %1 {offsets = [16, 10], sizes = [8, 72], strides = [1, 1]} : vector<32x82xbf16> to vector<8x72xbf16>
    %16 = vector.extract_strided_slice %1 {offsets = [24, 0], sizes = [8, 72], strides = [1, 1]} : vector<32x82xbf16> to vector<8x72xbf16>
    %17 = vector.extract_strided_slice %1 {offsets = [24, 1], sizes = [8, 72], strides = [1, 1]} : vector<32x82xbf16> to vector<8x72xbf16>
    %18 = vector.extract_strided_slice %1 {offsets = [24, 9], sizes = [8, 72], strides = [1, 1]} : vector<32x82xbf16> to vector<8x72xbf16>
    %19 = vector.extract_strided_slice %1 {offsets = [24, 10], sizes = [8, 72], strides = [1, 1]} : vector<32x82xbf16> to vector<8x72xbf16>
    %cst = arith.constant 0.000000e+00 : f32
    %20 = vector.broadcast %cst : f32 to vector<8x1xf32>
    %cst_7 = arith.constant 0.000000e+00 : f32
    %21 = vector.broadcast %cst_7 : f32 to vector<8x1xf32>
    %cst_8 = arith.constant 0.000000e+00 : f32
    %22 = vector.broadcast %cst_8 : f32 to vector<8x72xf32>
    %23 = vector.extract_strided_slice %2 {offsets = [0, 0, 0], sizes = [1, 8, 8], strides = [1, 1, 1]} : vector<9x8x8xbf16> to vector<1x8x8xbf16>
    %24 = vector.shape_cast %23 : vector<1x8x8xbf16> to vector<8x8xbf16>
    %cst_9 = arith.constant dense<0.000000e+00> : vector<8x72xf32>
    %25 = tpu.matmul %24, %4, %cst_9 {dimension_numbers = #tpu.dot_dimension_numbers<[1], [0], [0], [1], [0, 0, 1, 1], [], []>} : vector<8x8xbf16>, vector<8x72xbf16>, vector<8x72xf32> -> vector<8x72xf32>
    %26 = arith.addf %22, %25 : vector<8x72xf32>
    %27 = vector.extract_strided_slice %2 {offsets = [1, 0, 0], sizes = [1, 8, 8], strides = [1, 1, 1]} : vector<9x8x8xbf16> to vector<1x8x8xbf16>
    %28 = vector.shape_cast %27 : vector<1x8x8xbf16> to vector<8x8xbf16>
    %cst_10 = arith.constant dense<0.000000e+00> : vector<8x72xf32>
    %29 = tpu.matmul %28, %8, %cst_10 {dimension_numbers = #tpu.dot_dimension_numbers<[1], [0], [0], [1], [0, 0, 1, 1], [], []>} : vector<8x8xbf16>, vector<8x72xbf16>, vector<8x72xf32> -> vector<8x72xf32>
    %30 = arith.addf %26, %29 : vector<8x72xf32>
    %31 = vector.extract_strided_slice %2 {offsets = [2, 0, 0], sizes = [1, 8, 8], strides = [1, 1, 1]} : vector<9x8x8xbf16> to vector<1x8x8xbf16>
    %32 = vector.shape_cast %31 : vector<1x8x8xbf16> to vector<8x8xbf16>
    %cst_11 = arith.constant dense<0.000000e+00> : vector<8x72xf32>
    %33 = tpu.matmul %32, %5, %cst_11 {dimension_numbers = #tpu.dot_dimension_numbers<[1], [0], [0], [1], [0, 0, 1, 1], [], []>} : vector<8x8xbf16>, vector<8x72xbf16>, vector<8x72xf32> -> vector<8x72xf32>
    %34 = arith.addf %30, %33 : vector<8x72xf32>
    %35 = vector.extract_strided_slice %2 {offsets = [3, 0, 0], sizes = [1, 8, 8], strides = [1, 1, 1]} : vector<9x8x8xbf16> to vector<1x8x8xbf16>
    %36 = vector.shape_cast %35 : vector<1x8x8xbf16> to vector<8x8xbf16>
    %cst_12 = arith.constant dense<0.000000e+00> : vector<8x72xf32>
    %37 = tpu.matmul %36, %12, %cst_12 {dimension_numbers = #tpu.dot_dimension_numbers<[1], [0], [0], [1], [0, 0, 1, 1], [], []>} : vector<8x8xbf16>, vector<8x72xbf16>, vector<8x72xf32> -> vector<8x72xf32>
    %38 = arith.addf %34, %37 : vector<8x72xf32>
    %39 = vector.extract_strided_slice %2 {offsets = [4, 0, 0], sizes = [1, 8, 8], strides = [1, 1, 1]} : vector<9x8x8xbf16> to vector<1x8x8xbf16>
    %40 = vector.shape_cast %39 : vector<1x8x8xbf16> to vector<8x8xbf16>
    %cst_13 = arith.constant dense<0.000000e+00> : vector<8x72xf32>
    %41 = tpu.matmul %40, %16, %cst_13 {dimension_numbers = #tpu.dot_dimension_numbers<[1], [0], [0], [1], [0, 0, 1, 1], [], []>} : vector<8x8xbf16>, vector<8x72xbf16>, vector<8x72xf32> -> vector<8x72xf32>
    %42 = arith.addf %38, %41 : vector<8x72xf32>
    %43 = vector.extract_strided_slice %2 {offsets = [5, 0, 0], sizes = [1, 8, 8], strides = [1, 1, 1]} : vector<9x8x8xbf16> to vector<1x8x8xbf16>
    %44 = vector.shape_cast %43 : vector<1x8x8xbf16> to vector<8x8xbf16>
    %cst_14 = arith.constant dense<0.000000e+00> : vector<8x72xf32>
    %45 = tpu.matmul %44, %13, %cst_14 {dimension_numbers = #tpu.dot_dimension_numbers<[1], [0], [0], [1], [0, 0, 1, 1], [], []>} : vector<8x8xbf16>, vector<8x72xbf16>, vector<8x72xf32> -> vector<8x72xf32>
    %46 = arith.addf %42, %45 : vector<8x72xf32>
    %47 = vector.extract_strided_slice %2 {offsets = [6, 0, 0], sizes = [1, 8, 8], strides = [1, 1, 1]} : vector<9x8x8xbf16> to vector<1x8x8xbf16>
    %48 = vector.shape_cast %47 : vector<1x8x8xbf16> to vector<8x8xbf16>
    %cst_15 = arith.constant dense<0.000000e+00> : vector<8x72xf32>
    %49 = tpu.matmul %48, %6, %cst_15 {dimension_numbers = #tpu.dot_dimension_numbers<[1], [0], [0], [1], [0, 0, 1, 1], [], []>} : vector<8x8xbf16>, vector<8x72xbf16>, vector<8x72xf32> -> vector<8x72xf32>
    %50 = arith.addf %46, %49 : vector<8x72xf32>
    %51 = vector.extract_strided_slice %2 {offsets = [7, 0, 0], sizes = [1, 8, 8], strides = [1, 1, 1]} : vector<9x8x8xbf16> to vector<1x8x8xbf16>
    %52 = vector.shape_cast %51 : vector<1x8x8xbf16> to vector<8x8xbf16>
    %cst_16 = arith.constant dense<0.000000e+00> : vector<8x72xf32>
    %53 = tpu.matmul %52, %10, %cst_16 {dimension_numbers = #tpu.dot_dimension_numbers<[1], [0], [0], [1], [0, 0, 1, 1], [], []>} : vector<8x8xbf16>, vector<8x72xbf16>, vector<8x72xf32> -> vector<8x72xf32>
    %54 = arith.addf %50, %53 : vector<8x72xf32>
    %55 = vector.extract_strided_slice %2 {offsets = [8, 0, 0], sizes = [1, 8, 8], strides = [1, 1, 1]} : vector<9x8x8xbf16> to vector<1x8x8xbf16>
    %56 = vector.shape_cast %55 : vector<1x8x8xbf16> to vector<8x8xbf16>
    %cst_17 = arith.constant dense<0.000000e+00> : vector<8x72xf32>
    %57 = tpu.matmul %56, %7, %cst_17 {dimension_numbers = #tpu.dot_dimension_numbers<[1], [0], [0], [1], [0, 0, 1, 1], [], []>} : vector<8x8xbf16>, vector<8x72xbf16>, vector<8x72xf32> -> vector<8x72xf32>
    %58 = arith.addf %54, %57 : vector<8x72xf32>
    %c0_18 = arith.constant 0 : index
    %c0_19 = arith.constant 0 : index
    %c0_20 = arith.constant 0 : index
    %59 = vector.load %arg4[%c0_18, %c0_19, %c0_20] : memref<1x32x72xf32, #tpu.memory_space<vmem>>, vector<1x8x72xf32>
    %60 = vector.shape_cast %59 : vector<1x8x72xf32> to vector<8x72xf32>
    %61 = vector.shape_cast %58 : vector<8x72xf32> to vector<1x8x72xf32>
    tpu.vector_store %arg4[%c0_18, %c0_19, %c0_20], %61 {strides = array<i32>} : memref<1x32x72xf32, #tpu.memory_space<vmem>>, vector<1x8x72xf32>,
    %62 = vector.broadcast %3 : vector<1x72xf32> to vector<8x72xf32>
    %63 = arith.mulf %58, %62 : vector<8x72xf32>
    %cst_21 = arith.constant dense<0.000000e+00> : vector<8xf32>
    %64 = vector.multi_reduction <add>, %63, %cst_21 [1] : vector<8x72xf32> to vector<8xf32>
    %65 = vector.shape_cast %64 : vector<8xf32> to vector<8x1xf32>
    %66 = arith.addf %20, %65 : vector<8x1xf32>
    %67 = arith.mulf %63, %58 : vector<8x72xf32>
    %cst_22 = arith.constant dense<0.000000e+00> : vector<8xf32>
    %68 = vector.multi_reduction <add>, %67, %cst_22 [1] : vector<8x72xf32> to vector<8xf32>
    %69 = vector.shape_cast %68 : vector<8xf32> to vector<8x1xf32>
    %70 = arith.addf %21, %69 : vector<8x1xf32>
    %cst_23 = arith.constant 0.000000e+00 : f32
    %71 = vector.broadcast %cst_23 : f32 to vector<8x72xf32>
    %72 = vector.extract_strided_slice %2 {offsets = [0, 0, 0], sizes = [1, 8, 8], strides = [1, 1, 1]} : vector<9x8x8xbf16> to vector<1x8x8xbf16>
    %73 = vector.shape_cast %72 : vector<1x8x8xbf16> to vector<8x8xbf16>
    %cst_24 = arith.constant dense<0.000000e+00> : vector<8x72xf32>
    %74 = tpu.matmul %73, %8, %cst_24 {dimension_numbers = #tpu.dot_dimension_numbers<[1], [0], [0], [1], [0, 0, 1, 1], [], []>} : vector<8x8xbf16>, vector<8x72xbf16>, vector<8x72xf32> -> vector<8x72xf32>
    %75 = arith.addf %71, %74 : vector<8x72xf32>
    %76 = vector.extract_strided_slice %2 {offsets = [1, 0, 0], sizes = [1, 8, 8], strides = [1, 1, 1]} : vector<9x8x8xbf16> to vector<1x8x8xbf16>
    %77 = vector.shape_cast %76 : vector<1x8x8xbf16> to vector<8x8xbf16>
    %cst_25 = arith.constant dense<0.000000e+00> : vector<8x72xf32>
    %78 = tpu.matmul %77, %5, %cst_25 {dimension_numbers = #tpu.dot_dimension_numbers<[1], [0], [0], [1], [0, 0, 1, 1], [], []>} : vector<8x8xbf16>, vector<8x72xbf16>, vector<8x72xf32> -> vector<8x72xf32>
    %79 = arith.addf %75, %78 : vector<8x72xf32>
    %80 = vector.extract_strided_slice %2 {offsets = [2, 0, 0], sizes = [1, 8, 8], strides = [1, 1, 1]} : vector<9x8x8xbf16> to vector<1x8x8xbf16>
    %81 = vector.shape_cast %80 : vector<1x8x8xbf16> to vector<8x8xbf16>
    %cst_26 = arith.constant dense<0.000000e+00> : vector<8x72xf32>
    %82 = tpu.matmul %81, %9, %cst_26 {dimension_numbers = #tpu.dot_dimension_numbers<[1], [0], [0], [1], [0, 0, 1, 1], [], []>} : vector<8x8xbf16>, vector<8x72xbf16>, vector<8x72xf32> -> vector<8x72xf32>
    %83 = arith.addf %79, %82 : vector<8x72xf32>
    %84 = vector.extract_strided_slice %2 {offsets = [3, 0, 0], sizes = [1, 8, 8], strides = [1, 1, 1]} : vector<9x8x8xbf16> to vector<1x8x8xbf16>
    %85 = vector.shape_cast %84 : vector<1x8x8xbf16> to vector<8x8xbf16>
    %cst_27 = arith.constant dense<0.000000e+00> : vector<8x72xf32>
    %86 = tpu.matmul %85, %16, %cst_27 {dimension_numbers = #tpu.dot_dimension_numbers<[1], [0], [0], [1], [0, 0, 1, 1], [], []>} : vector<8x8xbf16>, vector<8x72xbf16>, vector<8x72xf32> -> vector<8x72xf32>
    %87 = arith.addf %83, %86 : vector<8x72xf32>
    %88 = vector.extract_strided_slice %2 {offsets = [4, 0, 0], sizes = [1, 8, 8], strides = [1, 1, 1]} : vector<9x8x8xbf16> to vector<1x8x8xbf16>
    %89 = vector.shape_cast %88 : vector<1x8x8xbf16> to vector<8x8xbf16>
    %cst_28 = arith.constant dense<0.000000e+00> : vector<8x72xf32>
    %90 = tpu.matmul %89, %13, %cst_28 {dimension_numbers = #tpu.dot_dimension_numbers<[1], [0], [0], [1], [0, 0, 1, 1], [], []>} : vector<8x8xbf16>, vector<8x72xbf16>, vector<8x72xf32> -> vector<8x72xf32>
    %91 = arith.addf %87, %90 : vector<8x72xf32>
    %92 = vector.extract_strided_slice %2 {offsets = [5, 0, 0], sizes = [1, 8, 8], strides = [1, 1, 1]} : vector<9x8x8xbf16> to vector<1x8x8xbf16>
    %93 = vector.shape_cast %92 : vector<1x8x8xbf16> to vector<8x8xbf16>
    %cst_29 = arith.constant dense<0.000000e+00> : vector<8x72xf32>
    %94 = tpu.matmul %93, %17, %cst_29 {dimension_numbers = #tpu.dot_dimension_numbers<[1], [0], [0], [1], [0, 0, 1, 1], [], []>} : vector<8x8xbf16>, vector<8x72xbf16>, vector<8x72xf32> -> vector<8x72xf32>
    %95 = arith.addf %91, %94 : vector<8x72xf32>
    %96 = vector.extract_strided_slice %2 {offsets = [6, 0, 0], sizes = [1, 8, 8], strides = [1, 1, 1]} : vector<9x8x8xbf16> to vector<1x8x8xbf16>
    %97 = vector.shape_cast %96 : vector<1x8x8xbf16> to vector<8x8xbf16>
    %cst_30 = arith.constant dense<0.000000e+00> : vector<8x72xf32>
    %98 = tpu.matmul %97, %10, %cst_30 {dimension_numbers = #tpu.dot_dimension_numbers<[1], [0], [0], [1], [0, 0, 1, 1], [], []>} : vector<8x8xbf16>, vector<8x72xbf16>, vector<8x72xf32> -> vector<8x72xf32>
    %99 = arith.addf %95, %98 : vector<8x72xf32>
    %100 = vector.extract_strided_slice %2 {offsets = [7, 0, 0], sizes = [1, 8, 8], strides = [1, 1, 1]} : vector<9x8x8xbf16> to vector<1x8x8xbf16>
    %101 = vector.shape_cast %100 : vector<1x8x8xbf16> to vector<8x8xbf16>
    %cst_31 = arith.constant dense<0.000000e+00> : vector<8x72xf32>
    %102 = tpu.matmul %101, %7, %cst_31 {dimension_numbers = #tpu.dot_dimension_numbers<[1], [0], [0], [1], [0, 0, 1, 1], [], []>} : vector<8x8xbf16>, vector<8x72xbf16>, vector<8x72xf32> -> vector<8x72xf32>
    %103 = arith.addf %99, %102 : vector<8x72xf32>
    %104 = vector.extract_strided_slice %2 {offsets = [8, 0, 0], sizes = [1, 8, 8], strides = [1, 1, 1]} : vector<9x8x8xbf16> to vector<1x8x8xbf16>
    %105 = vector.shape_cast %104 : vector<1x8x8xbf16> to vector<8x8xbf16>
    %cst_32 = arith.constant dense<0.000000e+00> : vector<8x72xf32>
    %106 = tpu.matmul %105, %11, %cst_32 {dimension_numbers = #tpu.dot_dimension_numbers<[1], [0], [0], [1], [0, 0, 1, 1], [], []>} : vector<8x8xbf16>, vector<8x72xbf16>, vector<8x72xf32> -> vector<8x72xf32>
    %107 = arith.addf %103, %106 : vector<8x72xf32>
    %c0_33 = arith.constant 0 : index
    %c8 = arith.constant 8 : index
    %c0_34 = arith.constant 0 : index
    %108 = vector.load %arg4[%c0_33, %c8, %c0_34] : memref<1x32x72xf32, #tpu.memory_space<vmem>>, vector<1x8x72xf32>
    %109 = vector.shape_cast %108 : vector<1x8x72xf32> to vector<8x72xf32>
    %110 = vector.shape_cast %107 : vector<8x72xf32> to vector<1x8x72xf32>
    tpu.vector_store %arg4[%c0_33, %c8, %c0_34], %110 {strides = array<i32>} : memref<1x32x72xf32, #tpu.memory_space<vmem>>, vector<1x8x72xf32>,
    %111 = vector.broadcast %3 : vector<1x72xf32> to vector<8x72xf32>
    %112 = arith.mulf %107, %111 : vector<8x72xf32>
    %cst_35 = arith.constant dense<0.000000e+00> : vector<8xf32>
    %113 = vector.multi_reduction <add>, %112, %cst_35 [1] : vector<8x72xf32> to vector<8xf32>
    %114 = vector.shape_cast %113 : vector<8xf32> to vector<8x1xf32>
    %115 = arith.addf %66, %114 : vector<8x1xf32>
    %116 = arith.mulf %112, %107 : vector<8x72xf32>
    %cst_36 = arith.constant dense<0.000000e+00> : vector<8xf32>
    %117 = vector.multi_reduction <add>, %116, %cst_36 [1] : vector<8x72xf32> to vector<8xf32>
    %118 = vector.shape_cast %117 : vector<8xf32> to vector<8x1xf32>
    %119 = arith.addf %70, %118 : vector<8x1xf32>
    %cst_37 = arith.constant 0.000000e+00 : f32
    %120 = vector.broadcast %cst_37 : f32 to vector<8x72xf32>
    %121 = vector.extract_strided_slice %2 {offsets = [0, 0, 0], sizes = [1, 8, 8], strides = [1, 1, 1]} : vector<9x8x8xbf16> to vector<1x8x8xbf16>
    %122 = vector.shape_cast %121 : vector<1x8x8xbf16> to vector<8x8xbf16>
    %cst_38 = arith.constant dense<0.000000e+00> : vector<8x72xf32>
    %123 = tpu.matmul %122, %12, %cst_38 {dimension_numbers = #tpu.dot_dimension_numbers<[1], [0], [0], [1], [0, 0, 1, 1], [], []>} : vector<8x8xbf16>, vector<8x72xbf16>, vector<8x72xf32> -> vector<8x72xf32>
    %124 = arith.addf %120, %123 : vector<8x72xf32>
    %125 = vector.extract_strided_slice %2 {offsets = [1, 0, 0], sizes = [1, 8, 8], strides = [1, 1, 1]} : vector<9x8x8xbf16> to vector<1x8x8xbf16>
    %126 = vector.shape_cast %125 : vector<1x8x8xbf16> to vector<8x8xbf16>
    %cst_39 = arith.constant dense<0.000000e+00> : vector<8x72xf32>
    %127 = tpu.matmul %126, %16, %cst_39 {dimension_numbers = #tpu.dot_dimension_numbers<[1], [0], [0], [1], [0, 0, 1, 1], [], []>} : vector<8x8xbf16>, vector<8x72xbf16>, vector<8x72xf32> -> vector<8x72xf32>
    %128 = arith.addf %124, %127 : vector<8x72xf32>
    %129 = vector.extract_strided_slice %2 {offsets = [2, 0, 0], sizes = [1, 8, 8], strides = [1, 1, 1]} : vector<9x8x8xbf16> to vector<1x8x8xbf16>
    %130 = vector.shape_cast %129 : vector<1x8x8xbf16> to vector<8x8xbf16>
    %cst_40 = arith.constant dense<0.000000e+00> : vector<8x72xf32>
    %131 = tpu.matmul %130, %13, %cst_40 {dimension_numbers = #tpu.dot_dimension_numbers<[1], [0], [0], [1], [0, 0, 1, 1], [], []>} : vector<8x8xbf16>, vector<8x72xbf16>, vector<8x72xf32> -> vector<8x72xf32>
    %132 = arith.addf %128, %131 : vector<8x72xf32>
    %133 = vector.extract_strided_slice %2 {offsets = [3, 0, 0], sizes = [1, 8, 8], strides = [1, 1, 1]} : vector<9x8x8xbf16> to vector<1x8x8xbf16>
    %134 = vector.shape_cast %133 : vector<1x8x8xbf16> to vector<8x8xbf16>
    %cst_41 = arith.constant dense<0.000000e+00> : vector<8x72xf32>
    %135 = tpu.matmul %134, %6, %cst_41 {dimension_numbers = #tpu.dot_dimension_numbers<[1], [0], [0], [1], [0, 0, 1, 1], [], []>} : vector<8x8xbf16>, vector<8x72xbf16>, vector<8x72xf32> -> vector<8x72xf32>
    %136 = arith.addf %132, %135 : vector<8x72xf32>
    %137 = vector.extract_strided_slice %2 {offsets = [4, 0, 0], sizes = [1, 8, 8], strides = [1, 1, 1]} : vector<9x8x8xbf16> to vector<1x8x8xbf16>
    %138 = vector.shape_cast %137 : vector<1x8x8xbf16> to vector<8x8xbf16>
    %cst_42 = arith.constant dense<0.000000e+00> : vector<8x72xf32>
    %139 = tpu.matmul %138, %10, %cst_42 {dimension_numbers = #tpu.dot_dimension_numbers<[1], [0], [0], [1], [0, 0, 1, 1], [], []>} : vector<8x8xbf16>, vector<8x72xbf16>, vector<8x72xf32> -> vector<8x72xf32>
    %140 = arith.addf %136, %139 : vector<8x72xf32>
    %141 = vector.extract_strided_slice %2 {offsets = [5, 0, 0], sizes = [1, 8, 8], strides = [1, 1, 1]} : vector<9x8x8xbf16> to vector<1x8x8xbf16>
    %142 = vector.shape_cast %141 : vector<1x8x8xbf16> to vector<8x8xbf16>
    %cst_43 = arith.constant dense<0.000000e+00> : vector<8x72xf32>
    %143 = tpu.matmul %142, %7, %cst_43 {dimension_numbers = #tpu.dot_dimension_numbers<[1], [0], [0], [1], [0, 0, 1, 1], [], []>} : vector<8x8xbf16>, vector<8x72xbf16>, vector<8x72xf32> -> vector<8x72xf32>
    %144 = arith.addf %140, %143 : vector<8x72xf32>
    %145 = vector.extract_strided_slice %2 {offsets = [6, 0, 0], sizes = [1, 8, 8], strides = [1, 1, 1]} : vector<9x8x8xbf16> to vector<1x8x8xbf16>
    %146 = vector.shape_cast %145 : vector<1x8x8xbf16> to vector<8x8xbf16>
    %cst_44 = arith.constant dense<0.000000e+00> : vector<8x72xf32>
    %147 = tpu.matmul %146, %14, %cst_44 {dimension_numbers = #tpu.dot_dimension_numbers<[1], [0], [0], [1], [0, 0, 1, 1], [], []>} : vector<8x8xbf16>, vector<8x72xbf16>, vector<8x72xf32> -> vector<8x72xf32>
    %148 = arith.addf %144, %147 : vector<8x72xf32>
    %149 = vector.extract_strided_slice %2 {offsets = [7, 0, 0], sizes = [1, 8, 8], strides = [1, 1, 1]} : vector<9x8x8xbf16> to vector<1x8x8xbf16>
    %150 = vector.shape_cast %149 : vector<1x8x8xbf16> to vector<8x8xbf16>
    %cst_45 = arith.constant dense<0.000000e+00> : vector<8x72xf32>
    %151 = tpu.matmul %150, %18, %cst_45 {dimension_numbers = #tpu.dot_dimension_numbers<[1], [0], [0], [1], [0, 0, 1, 1], [], []>} : vector<8x8xbf16>, vector<8x72xbf16>, vector<8x72xf32> -> vector<8x72xf32>
    %152 = arith.addf %148, %151 : vector<8x72xf32>
    %153 = vector.extract_strided_slice %2 {offsets = [8, 0, 0], sizes = [1, 8, 8], strides = [1, 1, 1]} : vector<9x8x8xbf16> to vector<1x8x8xbf16>
    %154 = vector.shape_cast %153 : vector<1x8x8xbf16> to vector<8x8xbf16>
    %cst_46 = arith.constant dense<0.000000e+00> : vector<8x72xf32>
    %155 = tpu.matmul %154, %15, %cst_46 {dimension_numbers = #tpu.dot_dimension_numbers<[1], [0], [0], [1], [0, 0, 1, 1], [], []>} : vector<8x8xbf16>, vector<8x72xbf16>, vector<8x72xf32> -> vector<8x72xf32>
    %156 = arith.addf %152, %155 : vector<8x72xf32>
    %c0_47 = arith.constant 0 : index
    %c16 = arith.constant 16 : index
    %c0_48 = arith.constant 0 : index
    %157 = vector.load %arg4[%c0_47, %c16, %c0_48] : memref<1x32x72xf32, #tpu.memory_space<vmem>>, vector<1x8x72xf32>
    %158 = vector.shape_cast %157 : vector<1x8x72xf32> to vector<8x72xf32>
    %159 = vector.shape_cast %156 : vector<8x72xf32> to vector<1x8x72xf32>
    tpu.vector_store %arg4[%c0_47, %c16, %c0_48], %159 {strides = array<i32>} : memref<1x32x72xf32, #tpu.memory_space<vmem>>, vector<1x8x72xf32>,
    %160 = vector.broadcast %3 : vector<1x72xf32> to vector<8x72xf32>
    %161 = arith.mulf %156, %160 : vector<8x72xf32>
    %cst_49 = arith.constant dense<0.000000e+00> : vector<8xf32>
    %162 = vector.multi_reduction <add>, %161, %cst_49 [1] : vector<8x72xf32> to vector<8xf32>
    %163 = vector.shape_cast %162 : vector<8xf32> to vector<8x1xf32>
    %164 = arith.addf %115, %163 : vector<8x1xf32>
    %165 = arith.mulf %161, %156 : vector<8x72xf32>
    %cst_50 = arith.constant dense<0.000000e+00> : vector<8xf32>
    %166 = vector.multi_reduction <add>, %165, %cst_50 [1] : vector<8x72xf32> to vector<8xf32>
    %167 = vector.shape_cast %166 : vector<8xf32> to vector<8x1xf32>
    %168 = arith.addf %119, %167 : vector<8x1xf32>
    %cst_51 = arith.constant 0.000000e+00 : f32
    %169 = vector.broadcast %cst_51 : f32 to vector<8x72xf32>
    %170 = vector.extract_strided_slice %2 {offsets = [0, 0, 0], sizes = [1, 8, 8], strides = [1, 1, 1]} : vector<9x8x8xbf16> to vector<1x8x8xbf16>
    %171 = vector.shape_cast %170 : vector<1x8x8xbf16> to vector<8x8xbf16>
    %cst_52 = arith.constant dense<0.000000e+00> : vector<8x72xf32>
    %172 = tpu.matmul %171, %16, %cst_52 {dimension_numbers = #tpu.dot_dimension_numbers<[1], [0], [0], [1], [0, 0, 1, 1], [], []>} : vector<8x8xbf16>, vector<8x72xbf16>, vector<8x72xf32> -> vector<8x72xf32>
    %173 = arith.addf %169, %172 : vector<8x72xf32>
    %174 = vector.extract_strided_slice %2 {offsets = [1, 0, 0], sizes = [1, 8, 8], strides = [1, 1, 1]} : vector<9x8x8xbf16> to vector<1x8x8xbf16>
    %175 = vector.shape_cast %174 : vector<1x8x8xbf16> to vector<8x8xbf16>
    %cst_53 = arith.constant dense<0.000000e+00> : vector<8x72xf32>
    %176 = tpu.matmul %175, %13, %cst_53 {dimension_numbers = #tpu.dot_dimension_numbers<[1], [0], [0], [1], [0, 0, 1, 1], [], []>} : vector<8x8xbf16>, vector<8x72xbf16>, vector<8x72xf32> -> vector<8x72xf32>
    %177 = arith.addf %173, %176 : vector<8x72xf32>
    %178 = vector.extract_strided_slice %2 {offsets = [2, 0, 0], sizes = [1, 8, 8], strides = [1, 1, 1]} : vector<9x8x8xbf16> to vector<1x8x8xbf16>
    %179 = vector.shape_cast %178 : vector<1x8x8xbf16> to vector<8x8xbf16>
    %cst_54 = arith.constant dense<0.000000e+00> : vector<8x72xf32>
    %180 = tpu.matmul %179, %17, %cst_54 {dimension_numbers = #tpu.dot_dimension_numbers<[1], [0], [0], [1], [0, 0, 1, 1], [], []>} : vector<8x8xbf16>, vector<8x72xbf16>, vector<8x72xf32> -> vector<8x72xf32>
    %181 = arith.addf %177, %180 : vector<8x72xf32>
    %182 = vector.extract_strided_slice %2 {offsets = [3, 0, 0], sizes = [1, 8, 8], strides = [1, 1, 1]} : vector<9x8x8xbf16> to vector<1x8x8xbf16>
    %183 = vector.shape_cast %182 : vector<1x8x8xbf16> to vector<8x8xbf16>
    %cst_55 = arith.constant dense<0.000000e+00> : vector<8x72xf32>
    %184 = tpu.matmul %183, %10, %cst_55 {dimension_numbers = #tpu.dot_dimension_numbers<[1], [0], [0], [1], [0, 0, 1, 1], [], []>} : vector<8x8xbf16>, vector<8x72xbf16>, vector<8x72xf32> -> vector<8x72xf32>
    %185 = arith.addf %181, %184 : vector<8x72xf32>
    %186 = vector.extract_strided_slice %2 {offsets = [4, 0, 0], sizes = [1, 8, 8], strides = [1, 1, 1]} : vector<9x8x8xbf16> to vector<1x8x8xbf16>
    %187 = vector.shape_cast %186 : vector<1x8x8xbf16> to vector<8x8xbf16>
    %cst_56 = arith.constant dense<0.000000e+00> : vector<8x72xf32>
    %188 = tpu.matmul %187, %7, %cst_56 {dimension_numbers = #tpu.dot_dimension_numbers<[1], [0], [0], [1], [0, 0, 1, 1], [], []>} : vector<8x8xbf16>, vector<8x72xbf16>, vector<8x72xf32> -> vector<8x72xf32>
    %189 = arith.addf %185, %188 : vector<8x72xf32>
    %190 = vector.extract_strided_slice %2 {offsets = [5, 0, 0], sizes = [1, 8, 8], strides = [1, 1, 1]} : vector<9x8x8xbf16> to vector<1x8x8xbf16>
    %191 = vector.shape_cast %190 : vector<1x8x8xbf16> to vector<8x8xbf16>
    %cst_57 = arith.constant dense<0.000000e+00> : vector<8x72xf32>
    %192 = tpu.matmul %191, %11, %cst_57 {dimension_numbers = #tpu.dot_dimension_numbers<[1], [0], [0], [1], [0, 0, 1, 1], [], []>} : vector<8x8xbf16>, vector<8x72xbf16>, vector<8x72xf32> -> vector<8x72xf32>
    %193 = arith.addf %189, %192 : vector<8x72xf32>
    %194 = vector.extract_strided_slice %2 {offsets = [6, 0, 0], sizes = [1, 8, 8], strides = [1, 1, 1]} : vector<9x8x8xbf16> to vector<1x8x8xbf16>
    %195 = vector.shape_cast %194 : vector<1x8x8xbf16> to vector<8x8xbf16>
    %cst_58 = arith.constant dense<0.000000e+00> : vector<8x72xf32>
    %196 = tpu.matmul %195, %18, %cst_58 {dimension_numbers = #tpu.dot_dimension_numbers<[1], [0], [0], [1], [0, 0, 1, 1], [], []>} : vector<8x8xbf16>, vector<8x72xbf16>, vector<8x72xf32> -> vector<8x72xf32>
    %197 = arith.addf %193, %196 : vector<8x72xf32>
    %198 = vector.extract_strided_slice %2 {offsets = [7, 0, 0], sizes = [1, 8, 8], strides = [1, 1, 1]} : vector<9x8x8xbf16> to vector<1x8x8xbf16>
    %199 = vector.shape_cast %198 : vector<1x8x8xbf16> to vector<8x8xbf16>
    %cst_59 = arith.constant dense<0.000000e+00> : vector<8x72xf32>
    %200 = tpu.matmul %199, %15, %cst_59 {dimension_numbers = #tpu.dot_dimension_numbers<[1], [0], [0], [1], [0, 0, 1, 1], [], []>} : vector<8x8xbf16>, vector<8x72xbf16>, vector<8x72xf32> -> vector<8x72xf32>
    %201 = arith.addf %197, %200 : vector<8x72xf32>
    %202 = vector.extract_strided_slice %2 {offsets = [8, 0, 0], sizes = [1, 8, 8], strides = [1, 1, 1]} : vector<9x8x8xbf16> to vector<1x8x8xbf16>
    %203 = vector.shape_cast %202 : vector<1x8x8xbf16> to vector<8x8xbf16>
    %cst_60 = arith.constant dense<0.000000e+00> : vector<8x72xf32>
    %204 = tpu.matmul %203, %19, %cst_60 {dimension_numbers = #tpu.dot_dimension_numbers<[1], [0], [0], [1], [0, 0, 1, 1], [], []>} : vector<8x8xbf16>, vector<8x72xbf16>, vector<8x72xf32> -> vector<8x72xf32>
    %205 = arith.addf %201, %204 : vector<8x72xf32>
    %c0_61 = arith.constant 0 : index
    %c24 = arith.constant 24 : index
    %c0_62 = arith.constant 0 : index
    %206 = vector.load %arg4[%c0_61, %c24, %c0_62] : memref<1x32x72xf32, #tpu.memory_space<vmem>>, vector<1x8x72xf32>
    %207 = vector.shape_cast %206 : vector<1x8x72xf32> to vector<8x72xf32>
    %208 = vector.shape_cast %205 : vector<8x72xf32> to vector<1x8x72xf32>
    tpu.vector_store %arg4[%c0_61, %c24, %c0_62], %208 {strides = array<i32>} : memref<1x32x72xf32, #tpu.memory_space<vmem>>, vector<1x8x72xf32>,
    %209 = vector.broadcast %3 : vector<1x72xf32> to vector<8x72xf32>
    %210 = arith.mulf %205, %209 : vector<8x72xf32>
    %cst_63 = arith.constant dense<0.000000e+00> : vector<8xf32>
    %211 = vector.multi_reduction <add>, %210, %cst_63 [1] : vector<8x72xf32> to vector<8xf32>
    %212 = vector.shape_cast %211 : vector<8xf32> to vector<8x1xf32>
    %213 = arith.addf %164, %212 : vector<8x1xf32>
    %214 = arith.mulf %210, %205 : vector<8x72xf32>
    %cst_64 = arith.constant dense<0.000000e+00> : vector<8xf32>
    %215 = vector.multi_reduction <add>, %214, %cst_64 [1] : vector<8x72xf32> to vector<8xf32>
    %216 = vector.shape_cast %215 : vector<8xf32> to vector<8x1xf32>
    %217 = arith.addf %168, %216 : vector<8x1xf32>
    %218 = tpu.concatenate %213, %217 in 1 : vector<8x1xf32>, vector<8x1xf32> -> vector<8x2xf32>
    %c0_65 = arith.constant 0 : index
    %c0_66 = arith.constant 0 : index
    %c0_67 = arith.constant 0 : index
    %219 = vector.load %arg5[%c0_65, %c0_66, %c0_67] : memref<1x8x2xf32, #tpu.memory_space<vmem>>, vector<1x8x2xf32>
    %220 = vector.shape_cast %219 : vector<1x8x2xf32> to vector<8x2xf32>
    %221 = vector.shape_cast %218 : vector<8x2xf32> to vector<1x8x2xf32>
    tpu.vector_store %arg5[%c0_65, %c0_66, %c0_67], %221 {strides = array<i32>} : memref<1x8x2xf32, #tpu.memory_space<vmem>>, vector<1x8x2xf32>,
    return
  }
  func.func @transform_0(%arg0: i32) -> (i32, i32, i32) {
    %c0_i32 = arith.constant 0 : i32
    %c0_i32_0 = arith.constant 0 : i32
    %c0_i32_1 = arith.constant 0 : i32
    return %arg0, %c0_i32, %c0_i32_0 : i32, i32, i32
  }
  func.func @transform_1(%arg0: i32) -> (i32, i32, i32) {
    %c0_i32 = arith.constant 0 : i32
    %c0_i32_0 = arith.constant 0 : i32
    %c0_i32_1 = arith.constant 0 : i32
    %c0_i32_2 = arith.constant 0 : i32
    return %c0_i32, %c0_i32_0, %c0_i32_1 : i32, i32, i32
  }
  func.func @transform_2(%arg0: i32) -> (i32, i32) {
    %c0_i32 = arith.constant 0 : i32
    %c0_i32_0 = arith.constant 0 : i32
    %c0_i32_1 = arith.constant 0 : i32
    return %c0_i32, %c0_i32_0 : i32, i32
  }
  func.func @transform_3(%arg0: i32) -> (i32, i32, i32) {
    %c0_i32 = arith.constant 0 : i32
    %c0_i32_0 = arith.constant 0 : i32
    %c0_i32_1 = arith.constant 0 : i32
    return %arg0, %c0_i32, %c0_i32_0 : i32, i32, i32
  }
  func.func @transform_4(%arg0: i32) -> (i32, i32, i32) {
    %c0_i32 = arith.constant 0 : i32
    %c0_i32_0 = arith.constant 0 : i32
    %c0_i32_1 = arith.constant 0 : i32
    return %arg0, %c0_i32, %c0_i32_0 : i32, i32, i32
  }
}

</mosaic_0001>

<bundles_post_ra>
// kernel: conv_block_forward.3
= control target key start
LH: loop header
LB: loop body
LE: loop exit
PB: predicated region body
PF: predicated region fallthrough
CT: control target
= control target key end

     0   :  { %s302_s12 = smov 0   ;;  %s325_s0 = inlined_call_operand.vmem [shape: f32[2,32,72], index: 0, kind: input, shape index: {}]   ;;  %s326_s1 = inlined_call_operand.vmem [shape: f32[8,1], index: 1, kind: input, shape index: {}]   ;;  %s327_s2 = inlined_call_operand.vmem [shape: f32[8,1], index: 2, kind: input, shape index: {}]   ;;  %s328_s3 = inlined_call_operand.vmem [shape: f32[2,8,72], index: 3, kind: output, shape index: {}]  }
   0x1 LB: > { %s252_s13 = sadd.s32 4294967295, %s279_s12   ;;  %p256_p0 = scmp.ge.s32.totalorder %s279_s12, 1  ;;  %s279_s12 = sphi %s302_s12, %s13_s12  }
   0x2   : > { %p137_p1 = scmp.lt.s32.totalorder %s279_s12, 3 }
   0x4   : > { %p138_p2 = pnand %p256_p0, %p137_p1 }
   0x5   : > { %p160_p3 = scmp.lt.s32.totalorder (!%p138_p2), %s252_s13, 1 }
   0x6   : > { %141 = sbr.rel (%p138_p2) target bundleno = 152 (0x98), region = 32 }
   0xb   : > { %v173_v0 = vld [vmem:[%s326_s1] sm:$0xff]  ;;  %v281_v1 = vmov 0   ;;  %s330_s13 = smov (!%p160_p3, %s252_s13), 1  ;;  %vm197_vm0 = vcmask 588800  }
   0xc   : > { %272 = vset.pattern.permute.xlu0 %v281_v1  ;;  %v174_v2 = vld [vmem:[%s327_s2] sm:$0xff]  ;;  %s262_s18 = sshll.u32 %s330_s13, 5  ;;  %s259_s22 = sshll.u32 %s330_s13, 3 }
   0xd   : > { %177 = vperm.xlu0 %272, %v173_v0   ;;  %s164_s21 = scalar_lea.vmem %s325_s0, %s262_s18  ;;  %s168_s25 = scalar_lea.vmem %s328_s3, %s259_s22 }
   0xe   : > { %v169_v4 = vld [vmem:[%s164_s21] sm:$0xff]  ;;  %v170_v5 = vld [vmem:[%s164_s21 + $0x8] sm:$0xff]  ;;  %v171_v6 = vld [vmem:[%s164_s21 + $0x10] sm:$0xff] }
   0xf   : > { %v172_v10 = vld [vmem:[%s164_s21 + $0x18] sm:$0xff] }
  0x11   : > { %183 = vperm.xlu0 %272, %v174_v2  }
  0x88   : > { %v178_v3 = vpop.permute.xlu0 %177 }
  0x89   : > { %v180_v7 = vmul.f32 %v178_v3, %v169_v4  ;;  %v187_v8 = vmul.f32 %v178_v3, %v170_v5  ;;  %v190_v13 = vmul.f32 %v178_v3, %v171_v6  ;;  %v193_v16 = vmul.f32 %v178_v3, %v172_v10 }
  0x8c   : > { %v184_v9 = vpop.permute.xlu0 %183 }
  0x8d   : > { %v186_v11 = vadd.f32 %v184_v9, %v180_v7  ;;  %v188_v12 = vadd.f32 %v187_v8, %v184_v9  ;;  %v191_v15 = vadd.f32 %v190_v13, %v184_v9  ;;  %v194_v18 = vadd.f32 %v193_v16, %v184_v9 }
  0x8f   : > { %v189_v14 = vmax.f32 %v186_v11, %v188_v12 }
  0x91   : > { %v192_v17 = vmax.f32 %v189_v14, %v191_v15 }
  0x93   : > { %v195_v19 = vmax.f32 %v192_v17, %v194_v18 }
  0x95   : > { %v196_v20 = vmax.f32 %v195_v19, 0.0 }
  0x97   : > { %198 = vst.msk [vmem:[%s168_s25] sm:$0xff] %vm197_vm0, %v196_v20 }
  0x98 PF: > { %s13_s12 = sadd.s32 1, %s279_s12  }
  0x99   : > { %p10_p4 = scmp.ge.s32.totalorder %s13_s12, 4  }
  0x9b   :  { %12 = sbr.rel (!%p10_p4) target bundleno = 1 (0x1), region = 62 }

// kernel: conv_block_forward.2
= control target key start
LH: loop header
LB: loop body
LE: loop exit
PB: predicated region body
PF: predicated region fallthrough
CT: control target
= control target key end

     0   :  { %s2344_s15 = smov 0   ;;  %s2684_s0 = inlined_call_operand.vmem [shape: bf16[2,32,82], index: 0, kind: input, shape index: {}]   ;;  %s2685_s1 = inlined_call_operand.vmem [shape: bf16[9,8,8], index: 1, kind: input, shape index: {}]   ;;  %s2686_s2 = inlined_call_operand.vmem [shape: f32[1,72], index: 2, kind: input, shape index: {}]   ;;  %s2687_s3 = inlined_call_operand.vmem [shape: f32[2,32,72], index: 3, kind: output, shape index: {0}]   ;;  %s2688_s4 = inlined_call_operand.vmem [shape: f32[2,8,2], index: 4, kind: output, shape index: {1}]  }
   0x1 LB: > { %s1946_s16 = sadd.s32 4294967295, %s2312_s15   ;;  %p1950_p0 = scmp.ge.s32.totalorder %s2312_s15, 1  ;;  %s2312_s15 = sphi %s2344_s15, %s15_s15  }
   0x2   : > { %p165_p1 = scmp.lt.s32.totalorder %s2312_s15, 3 }
   0x4   : > { %p166_p2 = pnand %p1950_p0, %p165_p1 }
   0x5   : > { %p195_p3 = scmp.lt.s32.totalorder (!%p166_p2), %s1946_s16, 1  ;;  %s2316_s23 = smov (!%p166_p2), 127  }
   0x6   : > { %169 = sbr.rel (%p166_p2) target bundleno = 608 (0x260), region = 32  ;;  %s2317_s24 = smov (!%p166_p2), 119  }
   0x7   : > { %s2318_s29 = smov (!%p166_p2), 118  }
   0xb   : > { %v2314_v0 = vmov 0.0   ;;  %s2690_s16 = smov (!%p195_p3, %s1946_s16), 1  ;;  %vm2315_vm0 = vmmov 0   ;;  %vm228_vm1 = vcmask 1043456   ;;  %v2371_v7 = vld [vmem:[%s2685_s1] sm:$0xf] }
   0xc   : > { %2079 = vmatprep.subr.bf16.mxu1 %v2314_v0  ;;  %2073 = vmatprep.subr.bf16.mxu0 %v2314_v0  ;;  %s1999_s17 = sshll.u32 %s2690_s16, 4  ;;  %vm224_vm2 = vcmask 64512   ;;  %v2383_v11 = vld [vmem:[%s2685_s1 + $0x4] sm:$0xf]  ;;  %v2397_v13 = vld [vmem:[%s2685_s1 + $0xc] sm:$0xf] }
   0xd   : > { %2081 = vmatprep.mubr.msk.bf16.mxu1 %vm2315_vm0, %v2314_v0  ;;  %2075 = vmatprep.mubr.msk.bf16.mxu0 %vm2315_vm0, %v2314_v0  ;;  %s199_s20 = scalar_lea.vmem %s2684_s0, %s1999_s17  ;;  %v2407_v18 = vld [vmem:[%s2685_s1 + $0x8] sm:$0xf]  ;;  %v2422_v23 = vld [vmem:[%s2685_s1 + $0x14] sm:$0xf]  ;;  %v2437_v25 = vld [vmem:[%s2685_s1 + $0x10] sm:$0xf] }
   0xe   : > { %v210_v1 = vld [vmem:[%s199_s20] sm:$0xf]  ;;  %v212_v2 = vld [vmem:[%s199_s20 + $0x8] sm:$0xf]  ;;  %v211_v3 = vld [vmem:[%s199_s20 + $0x4] sm:$0xf] }
   0xf   : > { %v1958_v4 = vcombine.low %v210_v1, %v210_v1  ;;  %v276_v5 = vsel %vm228_vm1, %v210_v1, 0  ;;  %v2366_v6 = vsel %vm228_vm1, %v211_v3, 0  ;;  %v1962_v8 = vcombine.low %v212_v2, %v212_v2  ;;  %v213_v12 = vld [vmem:[%s199_s20 + $0xc] sm:$0xf]  ;;  %v2452_v27 = vld [vmem:[%s2685_s1 + $0x1c] sm:$0xf] }
  0x10   : > { %2080 = vmatpush3.bf16.msra.mxu1 %v276_v5  ;;  %v1965_v9 = vcombine.low %v211_v3, %v211_v3  ;;  %v2374_v10 = vsel %vm228_vm1, %v212_v2, 0  ;;  %2074 = vmatpush3.bf16.msra.mxu0 %v2366_v6  ;;  %v1974_v14 = vcombine.low %v213_v12, %v213_v12  ;;  %v2411_v19 = vsel %vm228_vm1, %v213_v12, 0  ;;  %v2462_v29 = vld [vmem:[%s2685_s1 + $0x18] sm:$0xf]  ;;  %v2482_v33 = vld [vmem:[%s2685_s1 + $0x20] sm:$0xf] }
  0x11   : > { %321 = vrot.lane.b32.xlu0 %v1958_v4, %s2316_s23  ;;  %516 = vrot.lane.b32.xlu1 %v1958_v4, %s2317_s24  ;;  %s2000_s18 = sshll.u32 %s2690_s16, 5  ;;  %vm666_vm3 = vcmask 588800   ;;  %vm1856_vm4 = vcmask 7168   ;;  %vm1858_vm5 = vcmask 15360  }
  0x12   : > { %2091 = vmatprep.subr.bf16.mxu1 %v2314_v0  ;;  %2085 = vmatprep.subr.bf16.mxu0 %v2314_v0  ;;  %s2650_s21 = scalar_lea.vmem %s2687_s3, %s2000_s18 }
  0x13   : > { %2082 = vmatmul.mubr.msk.bf16.vlgmr.msra.gmra.mxu1 %vm224_vm2, %v2371_v7  ;;  %2076 = vmatmul.mubr.msk.bf16.vlgmr.msra.gmra.mxu0 %vm224_vm2, %v2383_v11 }
  0x14   : > { %2092 = vmatpush3.bf16.msra.mxu1 %v2374_v10  ;;  %2093 = vmatprep.mubr.msk.bf16.mxu1 %vm2315_vm0, %v2314_v0 }
  0x15   : > { %467 = vrot.lane.b32.xlu0 %v1962_v8, %s2316_s23  ;;  %568 = vrot.lane.b32.xlu1 %v1965_v9, %s2317_s24 }
  0x16   : > { %2103 = vmatprep.subr.bf16.mxu1 %v2314_v0  ;;  %2087 = vmatprep.mubr.msk.bf16.mxu0 %vm2315_vm0, %v2314_v0 }
  0x19   : > { %617 = vrot.lane.b32.xlu0 %v1958_v4, %s2318_s29  ;;  %764 = vrot.lane.b32.xlu1 %v1965_v9, %s2316_s23 }
  0x1b   : > { %2094 = vmatmul.mubr.msk.bf16.vlgmr.msra.gmra.mxu1 %vm224_vm2, %v2397_v13 }
  0x1c   : > { %2105 = vmatprep.mubr.msk.bf16.mxu1 %vm2315_vm0, %v2314_v0 }
  0x1d   : > { %895 = vrot.lane.b32.xlu0 %v1974_v14, %s2316_s23  ;;  %1023 = vrot.lane.b32.xlu1 %v1965_v9, %s2318_s29 }
  0x21   : > { %1370 = vrot.lane.b32.xlu1 %v1974_v14, %s2317_s24  ;;  %1324 = vrot.lane.b32.xlu0 %v1962_v8, %s2317_s24  ;;  %s1955_s24 = sshll.u32 %s2690_s16, 3 }
  0x22   : > { %s208_s27 = scalar_lea.vmem %s2688_s4, %s1955_s24 }
  0x25   : > { %1416 = vrot.lane.b32.xlu0 %v1962_v8, %s2318_s29  ;;  %1799 = vrot.lane.b32.xlu1 %v1974_v14, %s2318_s29 }
  0x83   : > { %v322_v15 = vpop.permute.xlu0 %321  ;;  %v517_v16 = vpop.permute.xlu1 %516 }
  0x84   : > { %v327_v17 = vsel %vm228_vm1, %v322_v15, 0  ;;  %v2443_v26 = vsel %vm228_vm1, %v517_v16, 0 }
  0x85   : > { %2086 = vmatpush3.bf16.msra.mxu0 %v327_v17 }
  0x86   : > { %2097 = vmatprep.subr.bf16.mxu0 %v2314_v0 }
  0x87   : > { %v468_v20 = vpop.permute.xlu0 %467  ;;  %v569_v21 = vpop.permute.xlu1 %568 }
  0x88   : > { %v2414_v22 = vsel %vm228_vm1, %v468_v20, 0  ;;  %2088 = vmatmul.mubr.msk.bf16.vlgmr.msra.gmra.mxu0 %vm224_vm2, %v2407_v18  ;;  %v2426_v24 = vsel %vm228_vm1, %v569_v21, 0 }
  0x89   : > { %2104 = vmatpush3.bf16.msra.mxu1 %v2414_v22  ;;  %2098 = vmatpush3.bf16.msra.mxu0 %v2411_v19 }
  0x8a   : > { %2099 = vmatprep.mubr.msk.bf16.mxu0 %vm2315_vm0, %v2314_v0  ;;  %2115 = vmatprep.subr.bf16.mxu1 %v2314_v0 }
  0x8b   : > { %2109 = vmatprep.subr.bf16.mxu0 %v2314_v0  ;;  %v618_v28 = vpop.permute.xlu0 %617  ;;  %v765_v31 = vpop.permute.xlu1 %764 }
  0x8c   : > { %2106 = vmatmul.mubr.msk.bf16.vlgmr.msra.gmra.mxu1 %vm224_vm2, %v2422_v23  ;;  %v2467_v30 = vsel %vm228_vm1, %v618_v28, 0  ;;  %v767_v32 = vsel %vm228_vm1, %v765_v31, 0 }
  0x8d   : > { %2116 = vmatpush3.bf16.msra.mxu1 %v2426_v24  ;;  %2117 = vmatprep.mubr.msk.bf16.mxu1 %vm2315_vm0, %v2314_v0 }
  0x8e   : > { %2127 = vmatprep.subr.bf16.mxu1 %v2314_v0 }
  0x8f   : > { %v896_v34 = vpop.permute.xlu0 %895  ;;  %v1024_v36 = vpop.permute.xlu1 %1023 }
  0x90   : > { %2100 = vmatmul.mubr.msk.bf16.vlgmr.msra.gmra.mxu0 %vm224_vm2, %v2437_v25  ;;  %v2511_v35 = vsel %vm228_vm1, %v896_v34, 0  ;;  %v2520_v37 = vsel %vm228_vm1, %v1024_v36, 0 }
  0x91   : > { %2110 = vmatpush3.bf16.msra.mxu0 %v2443_v26  ;;  %2111 = vmatprep.mubr.msk.bf16.mxu0 %vm2315_vm0, %v2314_v0 }
  0x92   : > { %2121 = vmatprep.subr.bf16.mxu0 %v2314_v0 }
  0x93   : > { %v1371_v38 = vpop.permute.xlu1 %1370  ;;  %v1325_v40 = vpop.permute.xlu0 %1324 }
  0x94   : > { %2118 = vmatmul.mubr.msk.bf16.vlgmr.msra.gmra.mxu1 %vm224_vm2, %v2452_v27  ;;  %v1373_v39 = vsel %vm228_vm1, %v1371_v38, 0  ;;  %v1327_v43 = vsel %vm228_vm1, %v1325_v40, 0 }
  0x95   : > { %2128 = vmatpush3.bf16.msra.mxu1 %v327_v17  ;;  %2129 = vmatprep.mubr.msk.bf16.mxu1 %vm2315_vm0, %v2314_v0 }
  0x96   : > { %2139 = vmatprep.subr.bf16.mxu1 %v2314_v0 }
  0x97   : > { %v1417_v50 = vpop.permute.xlu0 %1416  ;;  %v1800_v57 = vpop.permute.xlu1 %1799 }
  0x98   : > { %2112 = vmatmul.mubr.msk.bf16.vlgmr.msra.gmra.mxu0 %vm224_vm2, %v2462_v29  ;;  %v1419_v54 = vsel %vm228_vm1, %v1417_v50, 0  ;;  %v1802_v58 = vsel %vm228_vm1, %v1800_v57, 0 }
  0x99   : > { %2122 = vmatpush3.bf16.msra.mxu0 %v2467_v30  ;;  %2123 = vmatprep.mubr.msk.bf16.mxu0 %vm2315_vm0, %v2314_v0 }
  0x9a   : > { %2133 = vmatprep.subr.bf16.mxu0 %v2314_v0 }
  0x9c   : > { %2130 = vmatmul.mubr.msk.bf16.vlgmr.msra.gmra.mxu1 %vm224_vm2, %v2383_v11 }
  0x9d   : > { %2140 = vmatpush3.bf16.msra.mxu1 %v767_v32  ;;  %2141 = vmatprep.mubr.msk.bf16.mxu1 %vm2315_vm0, %v2314_v0 }
  0x9e   : > { %2151 = vmatprep.subr.bf16.mxu1 %v2314_v0 }
  0xa0   : > { %2124 = vmatmul.mubr.msk.bf16.vlgmr.msra.gmra.mxu0 %vm224_vm2, %v2482_v33 }
  0xa1   : > { %2134 = vmatpush3.bf16.msra.mxu0 %v2366_v6  ;;  %2135 = vmatprep.mubr.msk.bf16.mxu0 %vm2315_vm0, %v2314_v0 }
  0xa2   : > { %2145 = vmatprep.subr.bf16.mxu0 %v2314_v0 }
  0xa4   : > { %2142 = vmatmul.mubr.msk.bf16.vlgmr.msra.gmra.mxu1 %vm224_vm2, %v2407_v18 }
  0xa5   : > { %2152 = vmatpush3.bf16.msra.mxu1 %v2414_v22  ;;  %2153 = vmatprep.mubr.msk.bf16.mxu1 %vm2315_vm0, %v2314_v0 }
  0xa6   : > { %2163 = vmatprep.subr.bf16.mxu1 %v2314_v0 }
  0xa8   : > { %2136 = vmatmul.mubr.msk.bf16.vlgmr.msra.gmra.mxu0 %vm224_vm2, %v2371_v7 }
  0xa9   : > { %2146 = vmatpush3.bf16.msra.mxu0 %v2411_v19  ;;  %2147 = vmatprep.mubr.msk.bf16.mxu0 %vm2315_vm0, %v2314_v0 }
  0xaa   : > { %2157 = vmatprep.subr.bf16.mxu0 %v2314_v0 }
  0xac   : > { %2154 = vmatmul.mubr.msk.bf16.vlgmr.msra.gmra.mxu1 %vm224_vm2, %v2437_v25 }
  0xad   : > { %2164 = vmatpush3.bf16.msra.mxu1 %v2426_v24  ;;  %2165 = vmatprep.mubr.msk.bf16.mxu1 %vm2315_vm0, %v2314_v0 }
  0xae   : > { %2175 = vmatprep.subr.bf16.mxu1 %v2314_v0 }
  0xb0   : > { %2148 = vmatmul.mubr.msk.bf16.vlgmr.msra.gmra.mxu0 %vm224_vm2, %v2397_v13 }
  0xb1   : > { %2158 = vmatpush3.bf16.msra.mxu0 %v2511_v35  ;;  %2159 = vmatprep.mubr.msk.bf16.mxu0 %vm2315_vm0, %v2314_v0 }
  0xb2   : > { %2169 = vmatprep.subr.bf16.mxu0 %v2314_v0 }
  0xb4   : > { %2166 = vmatmul.mubr.msk.bf16.vlgmr.msra.gmra.mxu1 %vm224_vm2, %v2462_v29 }
  0xb5   : > { %2176 = vmatpush3.bf16.msra.mxu1 %v2520_v37  ;;  %2177 = vmatprep.mubr.msk.bf16.mxu1 %vm2315_vm0, %v2314_v0 }
  0xb6   : > { %2187 = vmatprep.subr.bf16.mxu1 %v2314_v0 }
  0xb8   : > { %2160 = vmatmul.mubr.msk.bf16.vlgmr.msra.gmra.mxu0 %vm224_vm2, %v2422_v23 }
  0xb9   : > { %2170 = vmatpush3.bf16.msra.mxu0 %v2467_v30  ;;  %2171 = vmatprep.mubr.msk.bf16.mxu0 %vm2315_vm0, %v2314_v0 }
  0xba   : > { %2181 = vmatprep.subr.bf16.mxu0 %v2314_v0 }
  0xbc   : > { %2178 = vmatmul.mubr.msk.bf16.vlgmr.msra.gmra.mxu1 %vm224_vm2, %v2482_v33 }
  0xbd   : > { %2188 = vmatpush3.bf16.msra.mxu1 %v2374_v10  ;;  %2189 = vmatprep.mubr.msk.bf16.mxu1 %vm2315_vm0, %v2314_v0 }
  0xbe   : > { %2199 = vmatprep.subr.bf16.mxu1 %v2314_v0 }
  0xc0   : > { %2172 = vmatmul.mubr.msk.bf16.vlgmr.msra.gmra.mxu0 %vm224_vm2, %v2452_v27 }
  0xc1   : > { %2182 = vmatpush3.bf16.msra.mxu0 %v2411_v19  ;;  %2183 = vmatprep.mubr.msk.bf16.mxu0 %vm2315_vm0, %v2314_v0 }
  0xc2   : > { %2193 = vmatprep.subr.bf16.mxu0 %v2314_v0 }
  0xc4   : > { %2190 = vmatmul.mubr.msk.bf16.vlgmr.msra.gmra.mxu1 %vm224_vm2, %v2371_v7 }
  0xc5   : > { %2200 = vmatpush3.bf16.msra.mxu1 %v2443_v26  ;;  %2201 = vmatprep.mubr.msk.bf16.mxu1 %vm2315_vm0, %v2314_v0 }
  0xc6   : > { %2211 = vmatprep.subr.bf16.mxu1 %v2314_v0 }
  0xc8   : > { %2184 = vmatmul.mubr.msk.bf16.vlgmr.msra.gmra.mxu0 %vm224_vm2, %v2383_v11 }
  0xc9   : > { %2194 = vmatpush3.bf16.msra.mxu0 %v2414_v22  ;;  %2195 = vmatprep.mubr.msk.bf16.mxu0 %vm2315_vm0, %v2314_v0 }
  0xca   : > { %2205 = vmatprep.subr.bf16.mxu0 %v2314_v0 }
  0xcc   : > { %2202 = vmatmul.mubr.msk.bf16.vlgmr.msra.gmra.mxu1 %vm224_vm2, %v2397_v13 }
  0xcd   : > { %2212 = vmatpush3.bf16.msra.mxu1 %v2467_v30  ;;  %2213 = vmatprep.mubr.msk.bf16.mxu1 %vm2315_vm0, %v2314_v0 }
  0xce   : > { %2223 = vmatprep.subr.bf16.mxu1 %v2314_v0 }
  0xd0   : > { %2196 = vmatmul.mubr.msk.bf16.vlgmr.msra.gmra.mxu0 %vm224_vm2, %v2407_v18 }
  0xd1   : > { %2206 = vmatpush3.bf16.msra.mxu0 %v2426_v24  ;;  %2207 = vmatprep.mubr.msk.bf16.mxu0 %vm2315_vm0, %v2314_v0 }
  0xd2   : > { %2217 = vmatprep.subr.bf16.mxu0 %v2314_v0 }
  0xd3   : > { %v312_v41 = vpop.f32.mrf.mxu1  ;;  %v266_v44 = vpop.f32.mrf.mxu0 }
  0xd4   : > { %2214 = vmatmul.mubr.msk.bf16.vlgmr.msra.gmra.mxu1 %vm224_vm2, %v2422_v23  ;;  %v2578_v45 = vadd.f32 %v312_v41, %v266_v44 }
  0xd5   : > { %2224 = vmatpush3.bf16.msra.mxu1 %v1373_v39  ;;  %2225 = vmatprep.mubr.msk.bf16.mxu1 %vm2315_vm0, %v2314_v0  ;;  %v2083_v42 = vpop.f32.mrf.mxu1  ;;  %v2077_v47 = vpop.f32.mrf.mxu0 }
  0xd6   : > { %2235 = vmatprep.subr.bf16.mxu1 %v2314_v0 }
  0xd7   : > { %v315_v46 = vpop.f32.mrf.mxu1  ;;  %v269_v49 = vpop.f32.mrf.mxu0 }
  0xd8   : > { %2208 = vmatmul.mubr.msk.bf16.vlgmr.msra.gmra.mxu0 %vm224_vm2, %v2437_v25 }
  0xd9   : > { %2218 = vmatpush3.bf16.msra.mxu0 %v1327_v43  ;;  %2219 = vmatprep.mubr.msk.bf16.mxu0 %vm2315_vm0, %v2314_v0  ;;  %v2084_v48 = vpop.f32.mrf.mxu1  ;;  %v2078_v52 = vpop.f32.mrf.mxu0 }
  0xda   : > { %2229 = vmatprep.subr.bf16.mxu0 %v2314_v0 }
  0xdb   : > { %v410_v51 = vpop.f32.mrf.mxu1 }
  0xdc   : > { %2226 = vmatmul.mubr.msk.bf16.vlgmr.msra.gmra.mxu1 %vm224_vm2, %v2452_v27 }
  0xdd   : > { %2236 = vmatpush3.bf16.msra.mxu1 %v2414_v22  ;;  %2237 = vmatprep.mubr.msk.bf16.mxu1 %vm2315_vm0, %v2314_v0  ;;  %v2095_v53 = vpop.f32.mrf.mxu1 }
  0xde   : > { %2247 = vmatprep.subr.bf16.mxu1 %v2314_v0 }
  0xdf   : > { %v413_v55 = vpop.f32.mrf.mxu1 }
  0xe0   : > { %2220 = vmatmul.mubr.msk.bf16.vlgmr.msra.gmra.mxu0 %vm224_vm2, %v2462_v29 }
  0xe1   : > { %2230 = vmatpush3.bf16.msra.mxu0 %v1419_v54  ;;  %2231 = vmatprep.mubr.msk.bf16.mxu0 %vm2315_vm0, %v2314_v0  ;;  %v2096_v56 = vpop.f32.mrf.mxu1 }
  0xe2   : > { %2241 = vmatprep.subr.bf16.mxu0 %v2314_v0 }
  0xe4   : > { %2238 = vmatmul.mubr.msk.bf16.vlgmr.msra.gmra.mxu1 %vm224_vm2, %v2383_v11 }
  0xe5   : > { %2248 = vmatpush3.bf16.msra.mxu1 %v2511_v35  ;;  %2249 = vmatprep.mubr.msk.bf16.mxu1 %vm2315_vm0, %v2314_v0 }
  0xe6   : > { %2259 = vmatprep.subr.bf16.mxu1 %v2314_v0 }
  0xe8   : > { %2232 = vmatmul.mubr.msk.bf16.vlgmr.msra.gmra.mxu0 %vm224_vm2, %v2482_v33 }
  0xe9   : > { %2242 = vmatpush3.bf16.msra.mxu0 %v2411_v19  ;;  %2243 = vmatprep.mubr.msk.bf16.mxu0 %vm2315_vm0, %v2314_v0 }
  0xea   : > { %2253 = vmatprep.subr.bf16.mxu0 %v2314_v0 }
  0xec   : > { %2250 = vmatmul.mubr.msk.bf16.vlgmr.msra.gmra.mxu1 %vm224_vm2, %v2407_v18 }
  0xed   : > { %2260 = vmatpush3.bf16.msra.mxu1 %v2467_v30  ;;  %2261 = vmatprep.mubr.msk.bf16.mxu1 %vm2315_vm0, %v2314_v0 }
  0xee   : > { %2271 = vmatprep.subr.bf16.mxu1 %v2314_v0 }
  0xf0   : > { %2244 = vmatmul.mubr.msk.bf16.vlgmr.msra.gmra.mxu0 %vm224_vm2, %v2371_v7 }
  0xf1   : > { %2254 = vmatpush3.bf16.msra.mxu0 %v2426_v24  ;;  %2255 = vmatprep.mubr.msk.bf16.mxu0 %vm2315_vm0, %v2314_v0 }
  0xf2   : > { %2265 = vmatprep.subr.bf16.mxu0 %v2314_v0 }
  0xf4   : > { %2262 = vmatmul.mubr.msk.bf16.vlgmr.msra.gmra.mxu1 %vm224_vm2, %v2437_v25  ;;  %v2655_v25 = vld [vmem:[%s2686_s2] ss:$0 sm:$0xff] }
  0xf5   : > { %2272 = vmatpush3.bf16.msra.mxu1 %v1373_v39  ;;  %2273 = vmatprep.mubr.msk.bf16.mxu1 %vm2315_vm0, %v2314_v0 }
  0xf6   : > { %2283 = vmatprep.subr.bf16.mxu1 %v2314_v0 }
  0xf8   : > { %2256 = vmatmul.mubr.msk.bf16.vlgmr.msra.gmra.mxu0 %vm224_vm2, %v2397_v13 }
  0xf9   : > { %2266 = vmatpush3.bf16.msra.mxu0 %v2520_v37  ;;  %2267 = vmatprep.mubr.msk.bf16.mxu0 %vm2315_vm0, %v2314_v0 }
  0xfa   : > { %2277 = vmatprep.subr.bf16.mxu0 %v2314_v0 }
  0xfc   : > { %2274 = vmatmul.mubr.msk.bf16.vlgmr.msra.gmra.mxu1 %vm224_vm2, %v2462_v29 }
  0xfd   : > { %2284 = vmatpush3.bf16.msra.mxu1 %v1802_v58  ;;  %2285 = vmatprep.mubr.msk.bf16.mxu1 %vm2315_vm0, %v2314_v0 }
 0x100   : > { %2268 = vmatmul.mubr.msk.bf16.vlgmr.msra.gmra.mxu0 %vm224_vm2, %v2422_v23 }
 0x101   : > { %2278 = vmatpush3.bf16.msra.mxu0 %v1419_v54  ;;  %2279 = vmatprep.mubr.msk.bf16.mxu0 %vm2315_vm0, %v2314_v0 }
 0x104   : > { %2286 = vmatmul.mubr.msk.bf16.vlgmr.msra.gmra.mxu1 %vm224_vm2, %v2482_v33 }
 0x108   : > { %2280 = vmatmul.mubr.msk.bf16.vlgmr.msra.gmra.mxu0 %vm224_vm2, %v2452_v27 }
 0x148   : > { %v363_v59 = vpop.f32.mrf.mxu0 }
 0x149   : > { %v369_v2 = vadd.f32 %v363_v59, %v2578_v45 }
 0x14a   : > { %v2089_v60 = vpop.f32.mrf.mxu0 }
 0x14b   : > { %v416_v0 = vadd.f32 %v410_v51, %v369_v2 }
 0x14c   : > { %v366_v61 = vpop.f32.mrf.mxu0  ;;  %v509_v62 = vpop.f32.mrf.mxu1 }
 0x14e   : > { %v2090_v63 = vpop.f32.mrf.mxu0  ;;  %v2107_v1 = vpop.f32.mrf.mxu1 }
 0x150   : > { %v457_v3 = vpop.f32.mrf.mxu0  ;;  %v512_v4 = vpop.f32.mrf.mxu1 }
 0x151   : > { %v463_v9 = vadd.f32 %v457_v3, %v416_v0 }
 0x152   : > { %v2101_v5 = vpop.f32.mrf.mxu0  ;;  %v2108_v6 = vpop.f32.mrf.mxu1 }
 0x153   : > { %v515_v14 = vadd.f32 %v509_v62, %v463_v9 }
 0x154   : > { %v460_v7 = vpop.f32.mrf.mxu0  ;;  %v610_v8 = vpop.f32.mrf.mxu1 }
 0x156   : > { %v2102_v10 = vpop.f32.mrf.mxu0  ;;  %v2119_v11 = vpop.f32.mrf.mxu1 }
 0x158   : > { %v558_v12 = vpop.f32.mrf.mxu0  ;;  %v613_v13 = vpop.f32.mrf.mxu1 }
 0x159   : > { %v564_v17 = vadd.f32 %v558_v12, %v515_v14 }
 0x15a   : > { %v2113_v15 = vpop.f32.mrf.mxu0  ;;  %v2120_v16 = vpop.f32.mrf.mxu1 }
 0x15b   : > { %v616_v22 = vadd.f32 %v610_v8, %v564_v17 }
 0x15c   : > { %v561_v18 = vpop.f32.mrf.mxu0  ;;  %v718_v19 = vpop.f32.mrf.mxu1 }
 0x15e   : > { %v2114_v20 = vpop.f32.mrf.mxu0  ;;  %v2131_v21 = vpop.f32.mrf.mxu1 }
 0x160   : > { %v659_v23 = vpop.f32.mrf.mxu0  ;;  %v721_v24 = vpop.f32.mrf.mxu1 }
 0x161   : > { %v665_v26 = vadd.f32 %v659_v23, %v616_v22 }
 0x162   : > { %v2125_v27 = vpop.f32.mrf.mxu0  ;;  %v2132_v28 = vpop.f32.mrf.mxu1 }
 0x163   : > { %667 = vst.msk [vmem:[%s2650_s21] sm:$0xff] %vm666_vm3, %v665_v26  ;;  %v674_v29 = vmul.f32 %v2655_v25, %v665_v26 }
 0x164   : > { %v662_v30 = vpop.f32.mrf.mxu0  ;;  %v803_v31 = vpop.f32.mrf.mxu1 }
 0x165   : > { %v675_v32 = vsel %vm666_vm3, %v674_v29, 0.0  ;;  %v679_v33 = vmul.f32 %v674_v29, %v665_v26 }
 0x166   : > { %v2126_v34 = vpop.f32.mrf.mxu0  ;;  %676 = vadd.xlane.f32.xlu0 %v675_v32  ;;  %v2143_v35 = vpop.f32.mrf.mxu1 }
 0x167   : > { %v680_v36 = vsel %vm666_vm3, %v679_v33, 0.0 }
 0x168   : > { %v758_v37 = vpop.f32.mrf.mxu0  ;;  %681 = vadd.xlane.f32.xlu1 %v680_v36  ;;  %v806_v38 = vpop.f32.mrf.mxu1 }
 0x169   : > { %v759_v45 = vadd.f32 %v758_v37, %v718_v19 }
 0x16a   : > { %v2137_v39 = vpop.f32.mrf.mxu0  ;;  %v2144_v40 = vpop.f32.mrf.mxu1 }
 0x16b   : > { %v809_v50 = vadd.f32 %v803_v31, %v759_v45 }
 0x16c   : > { %v761_v41 = vpop.f32.mrf.mxu0  ;;  %v885_v42 = vpop.f32.mrf.mxu1 }
 0x16e   : > { %v2138_v43 = vpop.f32.mrf.mxu0  ;;  %v2155_v44 = vpop.f32.mrf.mxu1 }
 0x170   : > { %v844_v46 = vpop.f32.mrf.mxu0  ;;  %v888_v47 = vpop.f32.mrf.mxu1 }
 0x171   : > { %v850_v53 = vadd.f32 %v844_v46, %v809_v50 }
 0x172   : > { %v2149_v48 = vpop.f32.mrf.mxu0  ;;  %v2156_v49 = vpop.f32.mrf.mxu1 }
 0x173   : > { %v891_v58 = vadd.f32 %v885_v42, %v850_v53 }
 0x174   : > { %v847_v51 = vpop.f32.mrf.mxu0  ;;  %v975_v52 = vpop.f32.mrf.mxu1 }
 0x176   : > { %v2150_v54 = vpop.f32.mrf.mxu0  ;;  %v2167_v55 = vpop.f32.mrf.mxu1 }
 0x178   : > { %v934_v56 = vpop.f32.mrf.mxu0  ;;  %v978_v57 = vpop.f32.mrf.mxu1 }
 0x179   : > { %v940_v61 = vadd.f32 %v934_v56, %v891_v58 }
 0x17a   : > { %v2161_v59 = vpop.f32.mrf.mxu0  ;;  %v2168_v60 = vpop.f32.mrf.mxu1 }
 0x17b   : > { %v981_v3 = vadd.f32 %v975_v52, %v940_v61 }
 0x17c   : > { %v937_v62 = vpop.f32.mrf.mxu0  ;;  %v1062_v63 = vpop.f32.mrf.mxu1 }
 0x17e   : > { %v2162_v1 = vpop.f32.mrf.mxu0  ;;  %v2179_v2 = vpop.f32.mrf.mxu1 }
 0x180   : > { %v1016_v4 = vpop.f32.mrf.mxu0  ;;  %v1065_v5 = vpop.f32.mrf.mxu1 }
 0x181   : > { %v1022_v6 = vadd.f32 %v1016_v4, %v981_v3 }
 0x182   : > { %v2173_v0 = vpop.f32.mrf.mxu0  ;;  %v2180_v7 = vpop.f32.mrf.mxu1 }
 0x183   : > { %v1068_v8 = vadd.f32 %v1062_v63, %v1022_v6 }
 0x184   : > { %v1019_v9 = vpop.f32.mrf.mxu0  ;;  %v1154_v10 = vpop.f32.mrf.mxu1 }
 0x185   : > { %1069 = vst.msk [vmem:[%s2650_s21 + $0x8] sm:$0xff] %vm666_vm3, %v1068_v8  ;;  %v1070_v11 = vmul.f32 %v2655_v25, %v1068_v8 }
 0x186   : > { %v2174_v12 = vpop.f32.mrf.mxu0  ;;  %v2191_v13 = vpop.f32.mrf.mxu1 }
 0x187   : > { %v1071_v14 = vsel %vm666_vm3, %v1070_v11, 0.0  ;;  %v1075_v15 = vmul.f32 %v1070_v11, %v1068_v8 }
 0x188   : > { %v1114_v16 = vpop.f32.mrf.mxu0  ;;  %1072 = vadd.xlane.f32.xlu0 %v1071_v14  ;;  %v1157_v17 = vpop.f32.mrf.mxu1 }
 0x189   : > { %v1076_v20 = vsel %vm666_vm3, %v1075_v15, 0.0  ;;  %v1155_v32 = vadd.f32 %v1154_v10, %v1114_v16 }
 0x18a   : > { %v2185_v18 = vpop.f32.mrf.mxu0  ;;  %v2192_v19 = vpop.f32.mrf.mxu1 }
 0x18c   : > { %v1117_v21 = vpop.f32.mrf.mxu0  ;;  %1077 = vadd.xlane.f32.xlu0 %v1076_v20  ;;  %v1235_v22 = vpop.f32.mrf.mxu1 }
 0x18e   : > { %v2186_v23 = vpop.f32.mrf.mxu0  ;;  %v2203_v24 = vpop.f32.mrf.mxu1 }
 0x190   : > { %v1194_v26 = vpop.f32.mrf.mxu0  ;;  %v1238_v27 = vpop.f32.mrf.mxu1 }
 0x191   : > { %v1200_v35 = vadd.f32 %v1194_v26, %v1155_v32 }
 0x192   : > { %v2197_v28 = vpop.f32.mrf.mxu0  ;;  %v2204_v29 = vpop.f32.mrf.mxu1 }
 0x193   : > { %v1241_v40 = vadd.f32 %v1235_v22, %v1200_v35 }
 0x194   : > { %v1197_v30 = vpop.f32.mrf.mxu0  ;;  %v1317_v31 = vpop.f32.mrf.mxu1 }
 0x196   : > { %v2198_v33 = vpop.f32.mrf.mxu0  ;;  %v2215_v34 = vpop.f32.mrf.mxu1 }
 0x198   : > { %v1276_v36 = vpop.f32.mrf.mxu0  ;;  %v1320_v37 = vpop.f32.mrf.mxu1 }
 0x199   : > { %v1282_v43 = vadd.f32 %v1276_v36, %v1241_v40 }
 0x19a   : > { %v2209_v38 = vpop.f32.mrf.mxu0  ;;  %v2216_v39 = vpop.f32.mrf.mxu1 }
 0x19b   : > { %v1323_v48 = vadd.f32 %v1317_v31, %v1282_v43 }
 0x19c   : > { %v1279_v41 = vpop.f32.mrf.mxu0  ;;  %v1409_v42 = vpop.f32.mrf.mxu1 }
 0x19e   : > { %v2210_v44 = vpop.f32.mrf.mxu0  ;;  %v2227_v45 = vpop.f32.mrf.mxu1 }
 0x1a0   : > { %v1363_v46 = vpop.f32.mrf.mxu0  ;;  %v1412_v47 = vpop.f32.mrf.mxu1 }
 0x1a1   : > { %v1369_v51 = vadd.f32 %v1363_v46, %v1323_v48 }
 0x1a2   : > { %v2221_v49 = vpop.f32.mrf.mxu0  ;;  %v2228_v50 = vpop.f32.mrf.mxu1 }
 0x1a3   : > { %v1415_v56 = vadd.f32 %v1409_v42, %v1369_v51 }
 0x1a4   : > { %v1366_v52 = vpop.f32.mrf.mxu0  ;;  %v1507_v53 = vpop.f32.mrf.mxu1 }
 0x1a6   : > { %v2222_v54 = vpop.f32.mrf.mxu0  ;;  %v2239_v55 = vpop.f32.mrf.mxu1 }
 0x1a8   : > { %v1455_v57 = vpop.f32.mrf.mxu0  ;;  %v1510_v58 = vpop.f32.mrf.mxu1 }
 0x1a9   : > { %v1461_v59 = vadd.f32 %v1455_v57, %v1415_v56 }
 0x1aa   : > { %v2233_v60 = vpop.f32.mrf.mxu0  ;;  %v2240_v61 = vpop.f32.mrf.mxu1 }
 0x1ab   : > { %1462 = vst.msk [vmem:[%s2650_s21 + $0x10] sm:$0xff] %vm666_vm3, %v1461_v59  ;;  %v1463_v62 = vmul.f32 %v2655_v25, %v1461_v59 }
 0x1ac   : > { %v1458_v63 = vpop.f32.mrf.mxu0  ;;  %v1587_v1 = vpop.f32.mrf.mxu1 }
 0x1ad   : > { %v1464_v2 = vsel %vm666_vm3, %v1463_v62, 0.0  ;;  %v1468_v3 = vmul.f32 %v1463_v62, %v1461_v59 }
 0x1ae   : > { %v2234_v4 = vpop.f32.mrf.mxu0  ;;  %1465 = vadd.xlane.f32.xlu1 %v1464_v2  ;;  %v2251_v5 = vpop.f32.mrf.mxu1 }
 0x1af   : > { %v1469_v6 = vsel %vm666_vm3, %v1468_v3, 0.0 }
 0x1b0   : > { %v1547_v0 = vpop.f32.mrf.mxu0  ;;  %1470 = vadd.xlane.f32.xlu0 %v1469_v6  ;;  %v1590_v7 = vpop.f32.mrf.mxu1 }
 0x1b1   : > { %v1548_v14 = vadd.f32 %v1547_v0, %v1507_v53 }
 0x1b2   : > { %v2245_v8 = vpop.f32.mrf.mxu0  ;;  %v2252_v9 = vpop.f32.mrf.mxu1 }
 0x1b3   : > { %v1593_v19 = vadd.f32 %v1587_v1, %v1548_v14 }
 0x1b4   : > { %v1550_v10 = vpop.f32.mrf.mxu0  ;;  %v1669_v11 = vpop.f32.mrf.mxu1 }
 0x1b6   : > { %v2246_v12 = vpop.f32.mrf.mxu0  ;;  %v2263_v13 = vpop.f32.mrf.mxu1 }
 0x1b8   : > { %v1628_v15 = vpop.f32.mrf.mxu0  ;;  %v1672_v16 = vpop.f32.mrf.mxu1 }
 0x1b9   : > { %v1634_v22 = vadd.f32 %v1628_v15, %v1593_v19 }
 0x1ba   : > { %v2257_v17 = vpop.f32.mrf.mxu0  ;;  %v2264_v18 = vpop.f32.mrf.mxu1 }
 0x1bb   : > { %v1675_v28 = vadd.f32 %v1669_v11, %v1634_v22 }
 0x1bc   : > { %v1631_v20 = vpop.f32.mrf.mxu0  ;;  %v1751_v21 = vpop.f32.mrf.mxu1 }
 0x1be   : > { %v2258_v23 = vpop.f32.mrf.mxu0  ;;  %v2275_v24 = vpop.f32.mrf.mxu1 }
 0x1c0   : > { %v1710_v26 = vpop.f32.mrf.mxu0  ;;  %v1754_v27 = vpop.f32.mrf.mxu1 }
 0x1c1   : > { %v1716_v31 = vadd.f32 %v1710_v26, %v1675_v28 }
 0x1c2   : > { %v2269_v29 = vpop.f32.mrf.mxu0  ;;  %v2276_v30 = vpop.f32.mrf.mxu1 }
 0x1c3   : > { %v1757_v36 = vadd.f32 %v1751_v21, %v1716_v31 }
 0x1c4   : > { %v1713_v32 = vpop.f32.mrf.mxu0  ;;  %v1838_v33 = vpop.f32.mrf.mxu1 }
 0x1c6   : > { %v2270_v34 = vpop.f32.mrf.mxu0  ;;  %v2287_v35 = vpop.f32.mrf.mxu1 }
 0x1c8   : > { %v1792_v37 = vpop.f32.mrf.mxu0  ;;  %v1841_v38 = vpop.f32.mrf.mxu1 }
 0x1c9   : > { %v1798_v39 = vadd.f32 %v1792_v37, %v1757_v36 }
 0x1ca   : > { %v2281_v40 = vpop.f32.mrf.mxu0  ;;  %v2288_v41 = vpop.f32.mrf.mxu1 }
 0x1cb   : > { %v1844_v42 = vadd.f32 %v1838_v33, %v1798_v39 }
 0x1cc   : > { %v1795_v43 = vpop.f32.mrf.mxu0 }
 0x1cd   : > { %1845 = vst.msk [vmem:[%s2650_s21 + $0x18] sm:$0xff] %vm666_vm3, %v1844_v42  ;;  %v1846_v44 = vmul.f32 %v2655_v25, %v1844_v42 }
 0x1ce   : > { %v2282_v45 = vpop.f32.mrf.mxu0 }
 0x1cf   : > { %v1847_v46 = vsel %vm666_vm3, %v1846_v44, 0.0  ;;  %v1851_v47 = vmul.f32 %v1846_v44, %v1844_v42 }
 0x1d0   : > { %1848 = vadd.xlane.f32.xlu1 %v1847_v46 }
 0x1d1   : > { %v1852_v48 = vsel %vm666_vm3, %v1851_v47, 0.0 }
 0x1d2   : > { %1853 = vadd.xlane.f32.xlu0 %v1852_v48 }
 0x1ef   : > { %v677_v49 = vpop.xlane.xlu0 %676 }
 0x1f1   : > { %v682_v51 = vpop.xlane.xlu1 %681 }
 0x211   : > { %v1073_v50 = vpop.xlane.xlu0 %1072 }
 0x212   : > { %v1074_v55 = vadd.f32 %v1073_v50, %v677_v49 }
 0x215   : > { %v1078_v52 = vpop.xlane.xlu0 %1077 }
 0x216   : > { %v1079_v56 = vadd.f32 %v1078_v52, %v682_v51 }
 0x237   : > { %v1466_v53 = vpop.xlane.xlu1 %1465 }
 0x238   : > { %v1467_v25 = vadd.f32 %v1466_v53, %v1074_v55 }
 0x239   : > { %v1471_v54 = vpop.xlane.xlu0 %1470 }
 0x23a   : > { %v1472_v58 = vadd.f32 %v1471_v54, %v1079_v56 }
 0x259   : > { %v1849_v57 = vpop.xlane.xlu1 %1848 }
 0x25a   : > { %v1850_v60 = vadd.f32 %v1849_v57, %v1467_v25 }
 0x25b   : > { %v1854_v59 = vpop.xlane.xlu0 %1853 }
 0x25c   : > { %v1855_v61 = vadd.f32 %v1854_v59, %v1472_v58 }
 0x25e   : > { %v1857_v62 = vsel %vm1856_vm4, %v1850_v60, %v1855_v61 }
 0x25f   : > { %1859 = vst.msk [vmem:[%s208_s27] sm:$0xff] %vm1858_vm5, %v1857_v62 }
 0x260 PF: > { %s15_s15 = sadd.s32 1, %s2312_s15  }
 0x261   : > { %p12_p4 = scmp.ge.s32.totalorder %s15_s15, 4  }
 0x263   :  { %14 = sbr.rel (!%p12_p4) target bundleno = 1 (0x1), region = 74 }

</bundles_post_ra>
